<compile_context>
chip_gen: v5e
topology: v5e:2x2
jax: 0.10.0
libtpu: 0.0.40
codegen_flags: <defaults>
</compile_context>

<pallas_src>
import functools

import jax
import jax.numpy as jnp
from jax.experimental import pallas as pl
from jax.experimental.pallas import tpu as pltpu


def chimera_kernel(x_ref, w_ref, b_ref, out_ref, *, ef, ed):
    efed = ef * ed
    x = x_ref[0]                                                    # (C_in, TT) f32

    # folded encoder + decoder + embedding head: one MXU pass, f32 accumulation
    fused = jnp.dot(w_ref[...], x,
                    preferred_element_type=jnp.float32) + b_ref[...]  # (EFED+C_out, TT)

    e = jax.nn.sigmoid(fused[:efed, :])                             # (EFED, TT) f32
    tt = e.shape[-1]

    # per-embd_dim L2 normalization (f32 epilogue; no eps, matching PyTorch —
    # safe because sigmoid outputs are strictly positive)
    if ed % 8 == 0:
        # ED is a whole number of f32 sublane tiles: the reshape is a pure
        # sublane regroup and the axis-1 reduce goes to the XLU (no copies).
        e3 = e.reshape(ef, ed, tt)                                  # (EF, ED, TT)
        inv = jax.lax.rsqrt(jnp.sum(e3 * e3, axis=1, keepdims=True))  # (EF, 1, TT)
        e_norm = (e3 * inv).reshape(efed, tt)
    else:
        # general-ED fallback: indicator-matrix reduce + broadcast on the MXU,
        # avoids masked sublane relayouts when ED doesn't align to (8,128).
        g = (jax.lax.broadcasted_iota(jnp.int32, (ef, efed), 1) // ed
             == jax.lax.broadcasted_iota(jnp.int32, (ef, efed), 0)
             ).astype(jnp.float32)                                  # (EF, EFED)
        gt = (jax.lax.broadcasted_iota(jnp.int32, (efed, ef), 0) // ed
              == jax.lax.broadcasted_iota(jnp.int32, (efed, ef), 1)
              ).astype(jnp.float32)                                 # (EFED, EF)
        ssq = jnp.dot(g, e * e, preferred_element_type=jnp.float32)   # (EF, TT)
        inv = jnp.dot(gt, jax.lax.rsqrt(ssq),
                      preferred_element_type=jnp.float32)           # (EFED, TT)
        e_norm = e * inv

    # single bf16 slab store: normalized head rows first, wave rows last
    out_ref[0, :efed, :] = e_norm.astype(out_ref.dtype)
    out_ref[0, efed:, :] = fused[efed:, :].astype(out_ref.dtype)


def _round_up(x, m):
    return -(-x // m) * m


def _choose_time_tiling(t, batch):
    """Pick a lane-dense time tile TT and padded length T_pad (multiple of TT)."""
    t128 = _round_up(max(t, 1), 128)
    if t128 <= 4096:
        tt = t128
        # keep >= 2 grid points so v7x's two TensorCores both get work
        if batch < 2 and t128 % 256 == 0:
            tt = t128 // 2
        return tt, t128
    # long inputs: biggest tile with <= 12.5% padding waste
    for tt in (8192, 4096, 2048, 1024, 512, 256, 128):
        t_pad = _round_up(t128, tt)
        if t_pad - t128 <= t128 // 8:
            return tt, t_pad
    return 128, t128


def chimera_forward(x_ncl, params, *, embd_feature, embd_dim):
    """x_ncl: (B, C_in, T) float32, PyTorch NCL layout."""
    B, C_in, T = x_ncl.shape
    w_enc, b_enc = params["enc"]      # (F, C_in), (F,)
    w_dec, b_dec = params["dec"]      # (C_out, F), (C_out,)
    w_emb, b_emb = params["emb"]      # (EF*ED, F), (EF*ED,)
    C_out = w_dec.shape[0]
    EF, ED = embd_feature, embd_dim
    EFED = EF * ED

    # Fold encoder into decoder + head ONCE, in f32 (layers compose exactly).
    # Head rows first so all head slices start on sublane-tile boundaries.
    wcat = jnp.concatenate([w_emb, w_dec], axis=0).astype(jnp.float32)  # (EFED+C_out, F)
    bcat = jnp.concatenate([b_emb, b_dec], axis=0).astype(jnp.float32)  # (EFED+C_out,)
    w_fused = wcat @ w_enc.astype(jnp.float32)                          # (EFED+C_out, C_in)
    b_fused = (wcat @ b_enc.astype(jnp.float32) + bcat).reshape(EFED + C_out, 1)

    TT, T_pad = _choose_time_tiling(T, B)
    x = x_ncl.astype(jnp.float32)                    # no-op if already f32 (no cast pass)
    if T_pad != T:
        x = jnp.pad(x, ((0, 0), (0, 0), (0, T_pad - T)))

    const2d = lambda b, t: (0, 0)
    kernel = functools.partial(chimera_kernel, ef=EF, ed=ED)
    slab = pl.pallas_call(
        kernel,
        out_shape=jax.ShapeDtypeStruct((B, EFED + C_out, T_pad), jnp.bfloat16),
        grid_spec=pltpu.PrefetchScalarGridSpec(
            num_scalar_prefetch=0,
            grid=(B, T_pad // TT),
            in_specs=[
                pl.BlockSpec((1, C_in, TT), lambda b, t: (b, 0, t)),
                pl.BlockSpec((EFED + C_out, C_in), const2d),
                pl.BlockSpec((EFED + C_out, 1), const2d),
            ],
            out_specs=pl.BlockSpec((1, EFED + C_out, TT), lambda b, t: (b, 0, t)),
        ),
        compiler_params=pltpu.CompilerParams(
            dimension_semantics=("parallel", "parallel")),
    )(x, w_fused, b_fused)

    # Split + crop.  waves is tiny -> upcast to f32 to match the module dtype.
    waves = slab[:, EFED:, :T].astype(jnp.float32)                       # (B, C_out, T)
    # embd keeps the module's (B, EF, T, ED) layout; the crop + unflatten +
    # transpose now moves bf16 bytes.  Returned bf16; upcast downstream only
    # if consumers really need f32.
    embd = jnp.swapaxes(slab[:, :EFED, :T].reshape(B, EF, ED, T), -1, -2)  # (B, EF, T, ED)
    return {"waves": waves, "embd": embd}


def reference_forward(x_ncl, params, *, embd_feature, embd_dim):
    """Pure-JAX f32 reference mirroring the PyTorch semantics (NCL 1x1 convs)."""
    w_enc, b_enc = params["enc"]
    w_dec, b_dec = params["dec"]
    w_emb, b_emb = params["emb"]
    conv1x1 = lambda x, w, b: jnp.einsum("bct,oc->bot", x, w) + b[None, :, None]
    embd = conv1x1(x_ncl, w_enc, b_enc)                     # (B, F, T)
    waves = conv1x1(embd, w_dec, b_dec)                     # (B, C_out, T)
    h = conv1x1(embd, w_emb, b_emb)                         # (B, EF*ED, T)
    B, _, T = h.shape
    h = h.reshape(B, embd_feature, embd_dim, T)             # unflatten(-2)
    h = jnp.swapaxes(h, -1, -2)                             # (B, EF, T, ED)
    h = jax.nn.sigmoid(h)
    h = h / jnp.linalg.norm(h, axis=-1, keepdims=True)
    return {"waves": waves, "embd": h}


if __name__ == "__main__":
    # small, shape-consistent hyperparameters; T=700 exercises the pad-to-128
    # path (T_pad=768, whole-T tile, grid=(2,1) -> 2 parallel grid points).
    B, C_in, T = 2, 4, 700
    F = 32                         # encoder feature size
    C_out = 2                      # decoder output channels
    EF, ED = 4, 8                  # embd_feature, embd_dim

    key = jax.random.PRNGKey(0)
    ks = jax.random.split(key, 7)
    params = {
        "enc": (0.2 * jax.random.normal(ks[0], (F, C_in), jnp.float32),
                0.1 * jax.random.normal(ks[1], (F,), jnp.float32)),
        "dec": (0.2 * jax.random.normal(ks[2], (C_out, F), jnp.float32),
                0.1 * jax.random.normal(ks[3], (C_out,), jnp.float32)),
        "emb": (0.2 * jax.random.normal(ks[4], (EF * ED, F), jnp.float32),
                0.1 * jax.random.normal(ks[5], (EF * ED,), jnp.float32)),
    }
    x = jax.random.normal(ks[6], (B, C_in, T), jnp.float32)

    out = chimera_forward(x, params, embd_feature=EF, embd_dim=ED)
    out = jax.tree_util.tree_map(jax.block_until_ready, out)

    ref = reference_forward(x, params, embd_feature=EF, embd_dim=ED)
    assert out["waves"].shape == (B, C_out, T)
    assert out["embd"].shape == (B, EF, T, ED)
    # bf16 output stores => bf16-level tolerance vs the f32 reference
    # (the matmul itself is now fully f32 thanks to the weight folding)
    assert jnp.allclose(out["waves"], ref["waves"], atol=2e-2, rtol=2e-2)
    assert jnp.allclose(out["embd"].astype(jnp.float32), ref["embd"],
                        atol=2e-2, rtol=2e-2)

    print("KERNEL_OK")
</pallas_src>

<mosaic_0001>
module attributes {stable_mosaic.version = 11 : i64} {
  func.func @chimera_kernel(%arg0: i32, %arg1: i32, %arg2: memref<1x4x768xf32, #tpu.memory_space<vmem>>, %arg3: memref<34x4xf32, #tpu.memory_space<vmem>>, %arg4: memref<34x1xf32, #tpu.memory_space<vmem>>, %arg5: memref<1x34x768xbf16, #tpu.memory_space<vmem>>) attributes {dimension_semantics = [#tpu.dimension_semantics<parallel>, #tpu.dimension_semantics<parallel>], iteration_bounds = array<i64: 2, 1>, scalar_prefetch = 0 : i64, scratch_operands = 0 : i64, tpu.core_type = #tpu.core_type<tc>, window_params = [{transform_indices = @transform_0, window_bounds = array<i64: 1, 4, 768>}, {pipeline_mode = #tpu.pipeline_mode<synchronous>, transform_indices = @transform_1, window_bounds = array<i64: 34, 4>}, {pipeline_mode = #tpu.pipeline_mode<synchronous>, transform_indices = @transform_2, window_bounds = array<i64: 34, 1>}, {transform_indices = @transform_3, window_bounds = array<i64: 1, 34, 768>}]} {
    %c0 = arith.constant 0 : index
    %c0_0 = arith.constant 0 : index
    %c0_1 = arith.constant 0 : index
    %0 = vector.load %arg2[%c0, %c0_0, %c0_1] : memref<1x4x768xf32, #tpu.memory_space<vmem>>, vector<1x4x768xf32>
    %1 = vector.shape_cast %0 : vector<1x4x768xf32> to vector<4x768xf32>
    %c0_2 = arith.constant 0 : index
    %c0_3 = arith.constant 0 : index
    %2 = vector.load %arg3[%c0_2, %c0_3] : memref<34x4xf32, #tpu.memory_space<vmem>>, vector<34x4xf32>
    %cst = arith.constant dense<0.000000e+00> : vector<34x768xf32>
    %3 = tpu.matmul %2, %1, %cst {dimension_numbers = #tpu.dot_dimension_numbers<[1], [0], [0], [1], [0, 0, 1, 1], [], []>} : vector<34x4xf32>, vector<4x768xf32>, vector<34x768xf32> -> vector<34x768xf32>
    %c0_4 = arith.constant 0 : index
    %c0_5 = arith.constant 0 : index
    %4 = vector.load %arg4[%c0_4, %c0_5] : memref<34x1xf32, #tpu.memory_space<vmem>>, vector<34x1xf32>
    %5 = vector.broadcast %4 : vector<34x1xf32> to vector<34x768xf32>
    %6 = arith.addf %3, %5 : vector<34x768xf32>
    %7 = vector.extract_strided_slice %6 {offsets = [0, 0], sizes = [32, 768], strides = [1, 1]} : vector<34x768xf32> to vector<32x768xf32>
    %8 = arith.negf %7 : vector<32x768xf32>
    %9 = math.exp %8 : vector<32x768xf32>
    %cst_6 = arith.constant 1.000000e+00 : f32
    %10 = vector.broadcast %cst_6 : f32 to vector<32x768xf32>
    %11 = arith.addf %10, %9 : vector<32x768xf32>
    %12 = arith.divf %10, %11 : vector<32x768xf32>
    %13 = vector.shape_cast %12 : vector<32x768xf32> to vector<4x8x768xf32>
    %14 = arith.mulf %13, %13 : vector<4x8x768xf32>
    %cst_7 = arith.constant dense<0.000000e+00> : vector<4x768xf32>
    %15 = vector.multi_reduction <add>, %14, %cst_7 [1] : vector<4x8x768xf32> to vector<4x768xf32>
    %16 = vector.shape_cast %15 : vector<4x768xf32> to vector<4x1x768xf32>
    %17 = math.rsqrt %16 : vector<4x1x768xf32>
    %18 = vector.broadcast %17 : vector<4x1x768xf32> to vector<4x8x768xf32>
    %19 = arith.mulf %13, %18 : vector<4x8x768xf32>
    %20 = vector.shape_cast %19 : vector<4x8x768xf32> to vector<32x768xf32>
    %21 = arith.truncf %20 : vector<32x768xf32> to vector<32x768xbf16>
    %c0_8 = arith.constant 0 : index
    %c0_9 = arith.constant 0 : index
    %c0_10 = arith.constant 0 : index
    %22 = vector.load %arg5[%c0_8, %c0_9, %c0_10] : memref<1x34x768xbf16, #tpu.memory_space<vmem>>, vector<1x32x768xbf16>
    %23 = vector.shape_cast %22 : vector<1x32x768xbf16> to vector<32x768xbf16>
    %24 = vector.shape_cast %21 : vector<32x768xbf16> to vector<1x32x768xbf16>
    tpu.vector_store %arg5[%c0_8, %c0_9, %c0_10], %24 {strides = array<i32>} : memref<1x34x768xbf16, #tpu.memory_space<vmem>>, vector<1x32x768xbf16>,
    %25 = vector.extract_strided_slice %6 {offsets = [32, 0], sizes = [2, 768], strides = [1, 1]} : vector<34x768xf32> to vector<2x768xf32>
    %26 = arith.truncf %25 : vector<2x768xf32> to vector<2x768xbf16>
    %c0_11 = arith.constant 0 : index
    %c32 = arith.constant 32 : index
    %c0_12 = arith.constant 0 : index
    %27 = vector.load %arg5[%c0_11, %c32, %c0_12] : memref<1x34x768xbf16, #tpu.memory_space<vmem>>, vector<1x2x768xbf16>
    %28 = vector.shape_cast %27 : vector<1x2x768xbf16> to vector<2x768xbf16>
    %29 = vector.shape_cast %26 : vector<2x768xbf16> to vector<1x2x768xbf16>
    tpu.vector_store %arg5[%c0_11, %c32, %c0_12], %29 {strides = array<i32>} : memref<1x34x768xbf16, #tpu.memory_space<vmem>>, vector<1x2x768xbf16>,
    return
  }
  func.func @transform_0(%arg0: i32, %arg1: i32) -> (i32, i32, i32) {
    %c0_i32 = arith.constant 0 : i32
    %c0_i32_0 = arith.constant 0 : i32
    return %arg0, %c0_i32, %arg1 : i32, i32, i32
  }
  func.func @transform_1(%arg0: i32, %arg1: i32) -> (i32, i32) {
    %c0_i32 = arith.constant 0 : i32
    %c0_i32_0 = arith.constant 0 : i32
    %c0_i32_1 = arith.constant 0 : i32
    return %c0_i32, %c0_i32_0 : i32, i32
  }
  func.func @transform_2(%arg0: i32, %arg1: i32) -> (i32, i32) {
    %c0_i32 = arith.constant 0 : i32
    %c0_i32_0 = arith.constant 0 : i32
    %c0_i32_1 = arith.constant 0 : i32
    return %c0_i32, %c0_i32_0 : i32, i32
  }
  func.func @transform_3(%arg0: i32, %arg1: i32) -> (i32, i32, i32) {
    %c0_i32 = arith.constant 0 : i32
    %c0_i32_0 = arith.constant 0 : i32
    return %arg0, %c0_i32, %arg1 : i32, i32, i32
  }
}

</mosaic_0001>

<bundles_post_ra>
// kernel: tpu_custom_call.1
= control target key start
LH: loop header
LB: loop body
LE: loop exit
PB: predicated region body
PF: predicated region fallthrough
CT: control target
= control target key end

     0   :  { %s1778_s12 = smov 0   ;;  %s1780_s13 = smov 0   ;;  %s2664_s0 = inlined_call_operand.vmem [shape: f32[2,4,768], index: 0, kind: input, shape index: {}]   ;;  %s2665_s1 = inlined_call_operand.vmem [shape: f32[34,4], index: 1, kind: input, shape index: {}]   ;;  %s2666_s2 = inlined_call_operand.vmem [shape: f32[34,1], index: 2, kind: input, shape index: {}]   ;;  %s2667_s3 = inlined_call_operand.vmem [shape: bf16[2,34,768], index: 3, kind: output, shape index: {}]  }
   0x1   :  { %s1782_s14 = smov 0  }
   0x2 LB: > { %s25_s15 = sadd.s32 1, %s1751_s13  ;;  %p1492_p0 = scmp.ge.s32.totalorder %s1755_s14, 1  ;;  %s1755_s14 = sphi %s1782_s14, %s13_s14   ;;  %s1751_s13 = sphi %s1780_s13, %s2719_s13   ;;  %s1747_s12 = sphi %s1778_s12, %s2718_s12  }
   0x3   : > { %p27_p1 = scmp.ge.s32.totalorder %s25_s15, 2  ;;  %p158_p2 = scmp.lt.s32.totalorder %s1755_s14, 3 }
   0x5   : > { %s2721_s15 = smov (%p27_p1, %s25_s15), 0  ;;  %p159_p3 = pnand %p1492_p0, %p158_p2 }
   0x6   : > { %p191_p4 = scmp.lt.s32.totalorder (!%p159_p3), %s1747_s12, 1 }
   0x7   : > { %162 = sbr.rel (%p159_p3) target bundleno = 400 (0x190), region = 32 }
   0xc   : > { %v1757_v0 = vmov 0   ;;  %v220_v1 = vld [vmem:[%s2666_s2 + $0x10] sm:$0xff]  ;;  %s2723_s12 = smov (!%p191_p4, %s1747_s12), 1  ;;  %v218_v2 = vld [vmem:[%s2666_s2] sm:$0xff]  ;;  %v221_v3 = vld [vmem:[%s2666_s2 + $0x18] sm:$0xff]  ;;  %vm278_vm0 = vcmask 1043456  }
   0xd   : > { %1587 = vset.pattern.permute.xlu1 %v1757_v0  ;;  %1586 = vset.pattern.permute.xlu0 %v1757_v0  ;;  %s1559_s20 = smul.u32 24, %s2723_s12  ;;  %v219_v7 = vld [vmem:[%s2666_s2 + $0x8] sm:$0xff]  ;;  %v213_v8 = vld [vmem:[%s2665_s1] sm:$0xff]  ;;  %vm262_vm1 = vcmask 31744   ;;  %v216_v9 = vld [vmem:[%s2665_s1 + $0x18] sm:$0xff] }
   0xe   : > { %235 = vperm.xlu1 %1587, %v220_v1   ;;  %1588 = vset.pattern.permute.xlu2 %v1757_v0  ;;  %v214_v16 = vld [vmem:[%s2665_s1 + $0x8] sm:$0xff]  ;;  %v217_v17 = vld [vmem:[%s2665_s1 + $0x20] sm:$0x3]  ;;  %v215_v18 = vld [vmem:[%s2665_s1 + $0x10] sm:$0xff]  ;;  %s1560_s17 = smul.u32 120, %s2723_s12 }
   0xf   : > { %225 = vperm.xlu0 %1586, %v218_v2   ;;  %s198_s23 = scalar_lea.vmem %s2664_s0, %s1559_s20  ;;  %v222_v19 = vld [vmem:[%s2666_s2 + $0x20] sm:$0x3] }
  0x10   : > { %v210_v4 = vld [vmem:[%s198_s23] sm:$0xff]  ;;  %v212_v5 = vld [vmem:[%s198_s23 + $0x10] sm:$0xff]  ;;  %v211_v6 = vld [vmem:[%s198_s23 + $0x8] sm:$0xff]  ;;  %245 = vperm.xlu2 %1588, %v222_v19   ;;  %s1900_s19 = scalar_lea.vmem %s2667_s3, %s1560_s17 }
  0x11   : > { %251 = vst [vmem:[#allocation1] ss:$2 sm:$0xff] %v210_v4 }
  0x12   : > { %255 = vst [vmem:[#allocation1 + $0x20] ss:$2 sm:$0xff] %v212_v5 }
  0x13   : > { %253 = vst [vmem:[#allocation1 + $0x10] ss:$2 sm:$0xff] %v211_v6 }
  0x16   : > { %240 = vperm.xlu1 %1587, %v221_v3  }
  0x17   : > { %230 = vperm.xlu0 %1586, %v219_v7  }
  0x18   : > { %v256_v10 = vld.sshfl [vmem:[#allocation1] sm:$0xff pattern:$0x75316420]  ;;  %v257_v11 = vld.sshfl [vmem:[#allocation1 + $0x8] sm:$0xff pattern:$0x75316420] }
  0x19   : > { %1495 = vmatpush.msk.msra.mxu0 %vm278_vm0, %v256_v10  ;;  %1557 = vmatpush.msk.msra.mxu2 %vm278_vm0, %v256_v10  ;;  %v260_v12 = vld.sshfl [vmem:[#allocation1 + $0x20] sm:$0xff pattern:$0x75316420]  ;;  %v261_v13 = vld.sshfl [vmem:[#allocation1 + $0x28] sm:$0xff pattern:$0x75316420] }
  0x1a   : > { %1501 = vmatpush.msk.msra.mxu1 %vm278_vm0, %v257_v11  ;;  %1558 = vmatpush.msk.msra.mxu3 %vm278_vm0, %v257_v11  ;;  %v258_v14 = vld.sshfl [vmem:[#allocation1 + $0x10] sm:$0xff pattern:$0x75316420]  ;;  %v259_v15 = vld.sshfl [vmem:[#allocation1 + $0x18] sm:$0xff pattern:$0x75316420] }
  0x1b   : > { %1496 = vmatmul.msk.f32.vlgmr.msra.gmra.mxu0 %vm262_vm1, %v213_v8  ;;  %1499 = vmatmul.msk.f32.vlgmr.msra.gmra.mxu2 %vm262_vm1, %v216_v9 }
  0x1c   : > { %1502 = vmatmul.msk.f32.vlgmr.msra.gmra.mxu1 %vm262_vm1, %v213_v8  ;;  %1505 = vmatmul.msk.f32.vlgmr.msra.gmra.mxu3 %vm262_vm1, %v216_v9 }
  0x1d   : > { %1519 = vmatpush.msk.msrb.mxu0 %vm278_vm0, %v260_v12  ;;  %1525 = vmatpush.msk.msrb.mxu1 %vm278_vm0, %v261_v13 }
  0x1e   : > { %1507 = vmatpush.msk.msrb.mxu2 %vm278_vm0, %v258_v14  ;;  %1513 = vmatpush.msk.msrb.mxu3 %vm278_vm0, %v259_v15 }
  0x23   : > { %1497 = vmatmul.msk.f32.gmra.mxu0 %vm262_vm1, %v214_v16  ;;  %1500 = vmatmul.msk.f32.gmra.mxu2 %vm262_vm1, %v217_v17 }
  0x24   : > { %1503 = vmatmul.msk.f32.gmra.mxu1 %vm262_vm1, %v214_v16  ;;  %1506 = vmatmul.msk.f32.gmra.mxu3 %vm262_vm1, %v217_v17 }
  0x2b   : > { %1498 = vmatmul.msk.f32.gmra.mxu0 %vm262_vm1, %v215_v18  ;;  %1508 = vmatmul.msk.f32.vlgmr.msrb.gmra.mxu2 %vm262_vm1, %v213_v8 }
  0x2c   : > { %1504 = vmatmul.msk.f32.gmra.mxu1 %vm262_vm1, %v215_v18  ;;  %1514 = vmatmul.msk.f32.vlgmr.msrb.gmra.mxu3 %vm262_vm1, %v213_v8 }
  0x33   : > { %1509 = vmatmul.msk.f32.gmra.mxu2 %vm262_vm1, %v214_v16  ;;  %1520 = vmatmul.msk.f32.vlgmr.msrb.gmra.mxu0 %vm262_vm1, %v213_v8 }
  0x34   : > { %1515 = vmatmul.msk.f32.gmra.mxu3 %vm262_vm1, %v214_v16  ;;  %1526 = vmatmul.msk.f32.vlgmr.msrb.gmra.mxu1 %vm262_vm1, %v213_v8 }
  0x3b   : > { %1510 = vmatmul.msk.f32.gmra.mxu2 %vm262_vm1, %v215_v18  ;;  %1521 = vmatmul.msk.f32.gmra.mxu0 %vm262_vm1, %v214_v16 }
  0x3c   : > { %1516 = vmatmul.msk.f32.gmra.mxu3 %vm262_vm1, %v215_v18  ;;  %1527 = vmatmul.msk.f32.gmra.mxu1 %vm262_vm1, %v214_v16 }
  0x43   : > { %1511 = vmatmul.msk.f32.gmra.mxu2 %vm262_vm1, %v216_v9  ;;  %1522 = vmatmul.msk.f32.gmra.mxu0 %vm262_vm1, %v215_v18 }
  0x44   : > { %1517 = vmatmul.msk.f32.gmra.mxu3 %vm262_vm1, %v216_v9  ;;  %1528 = vmatmul.msk.f32.gmra.mxu1 %vm262_vm1, %v215_v18 }
  0x4b   : > { %1523 = vmatmul.msk.f32.gmra.mxu0 %vm262_vm1, %v216_v9  ;;  %1512 = vmatmul.msk.f32.gmra.mxu2 %vm262_vm1, %v217_v17 }
  0x4c   : > { %1529 = vmatmul.msk.f32.gmra.mxu1 %vm262_vm1, %v216_v9  ;;  %1518 = vmatmul.msk.f32.gmra.mxu3 %vm262_vm1, %v217_v17 }
  0x53   : > { %1524 = vmatmul.msk.f32.gmra.mxu0 %vm262_vm1, %v217_v17 }
  0x54   : > { %1530 = vmatmul.msk.f32.gmra.mxu1 %vm262_vm1, %v217_v17 }
  0x6a   : > { %v1888_v46 = vpop.permute.xlu2 %245 }
  0x80   : > { %v1870_v20 = vpop.permute.xlu1 %235 }
  0x81   : > { %v1872_v21 = vpop.permute.xlu0 %225 }
  0x88   : > { %v1876_v28 = vpop.permute.xlu1 %240 }
  0x89   : > { %v1878_v30 = vpop.permute.xlu0 %230 }
  0x98   : > { %v308_v22 = vpop.f32.mrf.mxu0 }
  0x99   : > { %v309_v23 = vadd.f32 %v308_v22, %v1872_v21  ;;  %v340_v24 = vpop.f32.mrf.mxu1 }
  0x9a   : > { %v341_v25 = vadd.f32 %v340_v24, %v1872_v21 }
  0x9b   : > { %v1531_v26 = vmul.f32 -1.442695, %v309_v23 }
  0x9c   : > { %v1532_v27 = vmul.f32 -1.442695, %v341_v25 }
  0x9d   : > { %1589 = vpow2.f32 %v1531_v26 }
  0x9e   : > { %1591 = vpow2.f32 %v1532_v27  ;;  %v317_v29 = vpop.f32.mrf.mxu2 }
  0x9f   : > { %v318_v31 = vadd.f32 %v317_v29, %v1876_v28  ;;  %v349_v32 = vpop.f32.mrf.mxu3 }
  0xa0   : > { %v350_v33 = vadd.f32 %v349_v32, %v1876_v28  ;;  %v311_v34 = vpop.f32.mrf.mxu0 }
  0xa1   : > { %v1549_v35 = vmul.f32 -1.442695, %v318_v31  ;;  %v312_v36 = vadd.f32 %v311_v34, %v1878_v30  ;;  %v343_v37 = vpop.f32.mrf.mxu1 }
  0xa2   : > { %v1550_v38 = vmul.f32 -1.442695, %v350_v33  ;;  %v344_v39 = vadd.f32 %v343_v37, %v1878_v30 }
  0xa3   : > { %v1590_v40 = vpop.eup %1589  ;;  %1593 = vpow2.f32 %v1549_v35  ;;  %v1537_v41 = vmul.f32 -1.442695, %v312_v36 }
  0xa4   : > { %v1592_v42 = vpop.eup %1591  ;;  %v1884_v43 = vadd.f32 1.0, %v1590_v40  ;;  %1595 = vpow2.f32 %v1550_v38  ;;  %v1538_v44 = vmul.f32 -1.442695, %v344_v39 }
  0xa5   : > { %v1886_v45 = vadd.f32 1.0, %v1592_v42  ;;  %1597 = vpow2.f32 %v1537_v41 }
  0xa6   : > { %1599 = vrcp.f32 %v1884_v43  ;;  %v320_v47 = vpop.f32.mrf.mxu2  ;;  %v588_v52 = vand.u32 2147483647, %v1884_v43  ;;  %v590_v53 = vand.u32 2147483648, %v1884_v43  ;;  %vm584_vm2 = vweird.f32 %v1884_v43 }
  0xa7   : > { %1601 = vrcp.f32 %v1886_v45  ;;  %v352_v48 = vpop.f32.mrf.mxu3  ;;  %v321_v49 = vadd.f32 %v320_v47, %v1888_v46  ;;  %v603_v56 = vand.u32 2147483647, %v1886_v45  ;;  %vm599_vm3 = vweird.f32 %v1886_v45 }
  0xa8   : > { %1603 = vpow2.f32 %v1538_v44  ;;  %v314_v50 = vpop.f32.mrf.mxu0  ;;  %v353_v54 = vadd.f32 %v352_v48, %v1888_v46  ;;  %v605_v63 = vand.u32 2147483648, %v1886_v45  ;;  %vm1913_vm4 = vcmp.eq.f32.partialorder %v588_v52, 8.507059e+37 }
  0xa9   : > { %v1594_v51 = vpop.eup %1593  ;;  %v315_v58 = vadd.f32 %v314_v50, %v1870_v20  ;;  %v346_v0 = vpop.f32.mrf.mxu1  ;;  %v591_v4 = vor.u32 1.1754944e-38, %v590_v53  ;;  %vm1920_vm5 = vcmp.eq.f32.partialorder %v603_v56, 8.507059e+37 }
  0xaa   : > { %v1596_v55 = vpop.eup %1595  ;;  %v1903_v57 = vadd.f32 1.0, %v1594_v51  ;;  %v1395_v61 = vpack.c.bf16 %v353_v54, %v321_v49  ;;  %v347_v13 = vadd.f32 %v346_v0, %v1870_v20  ;;  %v606_v15 = vor.u32 1.1754944e-38, %v605_v63 }
  0xab   : > { %v1598_v59 = vpop.eup %1597  ;;  %v1906_v60 = vadd.f32 1.0, %v1596_v55  ;;  %v1543_v9 = vmul.f32 -1.442695, %v315_v58 }
  0xac   : > { %v1600_v62 = vpop.eup %1599  ;;  %1605 = vrcp.f32 %v1903_v57  ;;  %1398 = vst [vmem:[%s1900_s19 + $0x60] sm:$0x11] %v1395_v61  ;;  %v860_v8 = vand.u32 2147483648, %v1903_v57  ;;  %v858_v11 = vand.u32 2147483647, %v1903_v57  ;;  %v1926_v12 = vadd.f32 1.0, %v1598_v59 }
  0xad   : > { %v1602_v1 = vpop.eup %1601  ;;  %v580_v2 = vmul.f32 %v1600_v62, %v1884_v43  ;;  %1607 = vrcp.f32 %v1906_v60  ;;  %vm585_vm6 = vweird.f32 %v1600_v62  ;;  %vm854_vm7 = vweird.f32 %v1903_v57 }
  0xae   : > { %v1604_v5 = vpop.eup %1603  ;;  %v595_v6 = vmul.f32 %v1602_v1, %v1886_v45  ;;  %v873_v18 = vand.u32 2147483647, %v1906_v60  ;;  %v875_v19 = vand.u32 2147483648, %v1906_v60  ;;  %1609 = vrcp.f32 %v1926_v12  ;;  %vm586_vm11 = vmor %vm584_vm2, %vm585_vm6 }
  0xaf   : > { %v581_v10 = vsub.f32 1.0, %v580_v2  ;;  %v1929_v16 = vadd.f32 1.0, %v1604_v5  ;;  %vm600_vm8 = vweird.f32 %v1602_v1  ;;  %v861_v24 = vor.u32 1.1754944e-38, %v860_v8 }
  0xb0   : > { %v596_v14 = vsub.f32 1.0, %v595_v6  ;;  %vm869_vm9 = vweird.f32 %v1906_v60  ;;  %1611 = vpow2.f32 %v1543_v9  ;;  %vm1937_vm10 = vcmp.eq.f32.partialorder %v858_v11, 8.507059e+37  ;;  %vm601_vm12 = vmor %vm599_vm3, %vm600_vm8 }
  0xb1   : > { %v582_v17 = vmul.f32 %v1600_v62, %v581_v10  ;;  %1613 = vrcp.f32 %v1929_v16  ;;  %v1942_v31 = vmul.f32 -1.442695, %v347_v13  ;;  %v678_v34 = vand.u32 2147483647, %v1926_v12 }
  0xb2   : > { %v1606_v22 = vpop.eup %1605  ;;  %v597_v23 = vmul.f32 %v1602_v1, %v596_v14  ;;  %v680_v35 = vand.u32 2147483648, %v1926_v12  ;;  %vm1953_vm13 = vcmp.eq.f32.partialorder %v873_v18, 8.507059e+37  ;;  %v876_v39 = vor.u32 1.1754944e-38, %v875_v19 }
  0xb3   : > { %v1608_v25 = vpop.eup %1607  ;;  %v583_v26 = vadd.f32 %v1600_v62, %v582_v17  ;;  %v850_v27 = vmul.f32 %v1606_v22, %v1903_v57  ;;  %vm855_vm14 = vweird.f32 %v1606_v22  ;;  %vm674_vm15 = vweird.f32 %v1926_v12 }
  0xb4   : > { %v598_v32 = vadd.f32 %v1602_v1, %v597_v23  ;;  %v865_v33 = vmul.f32 %v1608_v25, %v1906_v60  ;;  %v1610_v43 = vpop.eup %1609  ;;  %vm870_vm0 = vweird.f32 %v1608_v25  ;;  %vm1971_vm1 = vcmp.eq.f32.partialorder %v678_v34, 8.507059e+37  ;;  %vm856_vm2 = vmor %vm854_vm7, %vm855_vm14 }
  0xb5   : > { %v587_v36 = vsel %vm586_vm11, %v1600_v62, %v583_v26  ;;  %v851_v37 = vsub.f32 1.0, %v850_v27  ;;  %v670_v51 = vmul.f32 %v1610_v43, %v1926_v12  ;;  %v681_v53 = vor.u32 1.1754944e-38, %v680_v35  ;;  %vm871_vm3 = vmor %vm869_vm9, %vm870_vm0 }
  0xb6   : > { %v1959_v40 = vsel %vm1913_vm4, %v591_v4, %v587_v36  ;;  %v602_v41 = vsel %vm601_vm12, %v1602_v1, %v598_v32  ;;  %v866_v42 = vsub.f32 1.0, %v865_v33  ;;  %v1612_v48 = vpop.eup %1611  ;;  %v693_v58 = vand.u32 2147483647, %v1929_v16 }
  0xb7   : > { %v939_v44 = vmul.f32 %v1959_v40, %v1959_v40  ;;  %v1966_v45 = vsel %vm1920_vm5, %v606_v15, %v602_v41  ;;  %v852_v47 = vmul.f32 %v1606_v22, %v851_v37  ;;  %v1614_v54 = vpop.eup %1613  ;;  %v695_v59 = vand.u32 2147483648, %v1929_v16 }
  0xb8   : > { %v940_v49 = vmul.f32 %v1966_v45, %v1966_v45  ;;  %v867_v50 = vmul.f32 %v1608_v25, %v866_v42  ;;  %v671_v63 = vsub.f32 1.0, %v670_v51  ;;  %v685_v0 = vmul.f32 %v1614_v54, %v1929_v16  ;;  %v372_v51 = vpop.f32.mrf.mxu2 }
  0xb9   : > { %v963_v55 = vrot.slane %v939_v44, 4  ;;  %v853_v56 = vadd.f32 %v1606_v22, %v852_v47  ;;  %vm675_vm4 = vweird.f32 %v1610_v43  ;;  %v1984_v3 = vadd.f32 1.0, %v1612_v48 }
  0xba   : > { %v969_v61 = vrot.slane %v940_v49, 4  ;;  %v868_v62 = vadd.f32 %v1608_v25, %v867_v50  ;;  %v672_v6 = vmul.f32 %v1610_v43, %v671_v63  ;;  %v686_v60 = vsub.f32 1.0, %v685_v0  ;;  %vm676_vm5 = vmor %vm674_vm15, %vm675_vm4 }
  0xbb   : > { %v964_v1 = vadd.f32 %v963_v55, %v939_v44  ;;  %v857_v2 = vsel %vm856_vm2, %v1606_v22, %v853_v56  ;;  %1615 = vrcp.f32 %v1984_v3  ;;  %vm690_vm6 = vweird.f32 %v1614_v54 }
  0xbc   : > { %v970_v4 = vadd.f32 %v969_v61, %v940_v49  ;;  %v1988_v5 = vsel %vm1937_vm10, %v861_v24, %v857_v2  ;;  %v872_v57 = vsel %vm871_vm3, %v1608_v25, %v868_v62  ;;  %v673_v13 = vadd.f32 %v1610_v43, %v672_v6 }
  0xbd   : > { %v965_v7 = vrot.slane %v964_v1, 2  ;;  %v957_v8 = vmul.f32 %v1988_v5, %v1988_v5  ;;  %v1994_v9 = vsel %vm1953_vm13, %v876_v39, %v872_v57  ;;  %v687_v17 = vmul.f32 %v1614_v54, %v686_v60  ;;  %v404_v57 = vpop.f32.mrf.mxu3  ;;  %v436_v60 = vpop.f32.mrf.mxu0 }
  0xbe   : > { %v971_v10 = vrot.slane %v970_v4, 2  ;;  %v958_v11 = vmul.f32 %v1994_v9, %v1994_v9  ;;  %v677_v22 = vsel %vm676_vm5, %v1610_v43, %v673_v13  ;;  %vm689_vm7 = vweird.f32 %v1929_v16 }
  0xbf   : > { %v966_v14 = vadd.f32 %v965_v7, %v964_v1  ;;  %v1071_v15 = vrot.slane %v957_v8, 4  ;;  %v2005_v25 = vsel %vm1971_vm1, %v681_v53, %v677_v22  ;;  %v688_v26 = vadd.f32 %v1614_v54, %v687_v17  ;;  %vm691_vm8 = vmor %vm689_vm7, %vm690_vm6 }
  0xc0   : > { %v972_v18 = vadd.f32 %v971_v10, %v970_v4  ;;  %v1077_v19 = vrot.slane %v958_v11, 4  ;;  %v945_v12 = vmul.f32 %v2005_v25, %v2005_v25  ;;  %v696_v32 = vor.u32 1.1754944e-38, %v695_v59 }
  0xc1   : > { %v967_v23 = vrot.slane %v966_v14, 1  ;;  %v1072_v24 = vadd.f32 %v1071_v15, %v957_v8  ;;  %v692_v35 = vsel %vm691_vm8, %v1614_v54, %v688_v26  ;;  %vm694_vm9 = vcmp.eq.f32.partialorder %v693_v58, 8.507059e+37  ;;  %v2011_v16 = vpop.eup %1615 }
  0xc2   : > { %v973_v27 = vrot.slane %v972_v18, 1  ;;  %v1078_v29 = vadd.f32 %v1077_v19, %v958_v11  ;;  %v999_v38 = vrot.slane %v945_v12, 4  ;;  %v2015_v39 = vsel %vm694_vm9, %v696_v32, %v692_v35 }
  0xc3   : > { %v2009_v33 = vadd.f32 %v967_v23, %v966_v14  ;;  %v1073_v34 = vrot.slane %v1072_v24, 2  ;;  %v946_v42 = vmul.f32 %v2015_v39, %v2015_v39  ;;  %v760_v49 = vmul.f32 %v2011_v16, %v1984_v3 }
  0xc4   : > { %v2013_v36 = vadd.f32 %v973_v27, %v972_v18  ;;  %v1079_v37 = vrot.slane %v1078_v29, 2  ;;  %v1000_v44 = vadd.f32 %v999_v38, %v945_v12  ;;  %v768_v50 = vand.u32 2147483647, %v1984_v3 }
  0xc5   : > { %1617 = vrsqrt.f32 %v2009_v33  ;;  %v1074_v41 = vadd.f32 %v1073_v34, %v1072_v24  ;;  %v1005_v48 = vrot.slane %v946_v42, 4  ;;  %v761_v56 = vsub.f32 1.0, %v760_v49 }
  0xc6   : > { %1619 = vrsqrt.f32 %v2013_v36  ;;  %v1080_v43 = vadd.f32 %v1079_v37, %v1078_v29  ;;  %v1001_v53 = vrot.slane %v1000_v44, 2  ;;  %vm764_vm10 = vweird.f32 %v1984_v3 }
  0xc7   : > { %v1075_v47 = vrot.slane %v1074_v41, 1  ;;  %1621 = vpow2.f32 %v1942_v31  ;;  %v1006_v55 = vadd.f32 %v1005_v48, %v946_v42  ;;  %v770_v61 = vand.u32 2147483648, %v1984_v3 }
  0xc8   : > { %v1081_v52 = vrot.slane %v1080_v43, 1  ;;  %v1002_v59 = vadd.f32 %v1001_v53, %v1000_v44  ;;  %v373_v62 = vadd.f32 %v372_v51, %v1872_v21  ;;  %v762_v1 = vmul.f32 %v2011_v16, %v761_v56 }
  0xc9   : > { %v2025_v54 = vadd.f32 %v1075_v47, %v1074_v41  ;;  %v1007_v0 = vrot.slane %v1006_v55, 2  ;;  %vm2034_vm11 = vcmp.eq.f32.partialorder %v768_v50, 8.507059e+37  ;;  %vm1113_vm12 = vweird.f32 %v2009_v33 }
  0xca   : > { %v2028_v58 = vadd.f32 %v1081_v52, %v1080_v43  ;;  %vm765_vm13 = vweird.f32 %v2011_v16  ;;  %vm1123_vm14 = vweird.f32 %v2013_v36  ;;  %v1003_v7 = vrot.slane %v1002_v59, 1 }
  0xcb   : > { %v1618_v63 = vpop.eup %1617  ;;  %1623 = vrsqrt.f32 %v2025_v54  ;;  %v1008_v8 = vadd.f32 %v1007_v0, %v1006_v55  ;;  %v763_v13 = vadd.f32 %v2011_v16, %v762_v1  ;;  %v771_v14 = vor.u32 1.1754944e-38, %v770_v61  ;;  %vm766_vm15 = vmor %vm764_vm10, %vm765_vm13 }
  0xcc   : > { %v1620_v2 = vpop.eup %1619  ;;  %v1108_v4 = vmul.f32 %v1618_v63, %v2009_v33  ;;  %1625 = vrsqrt.f32 %v2028_v58  ;;  %v1533_v15 = vmul.f32 -1.442695, %v373_v62  ;;  %v2045_v18 = vadd.f32 %v1003_v7, %v1002_v59 }
  0xcd   : > { %v1118_v6 = vmul.f32 %v1620_v2, %v2013_v36  ;;  %v1622_v10 = vpop.eup %1621  ;;  %v1009_v19 = vrot.slane %v1008_v8, 1  ;;  %v405_v22 = vadd.f32 %v404_v57, %v1872_v21  ;;  %vm1114_vm0 = vweird.f32 %v1618_v63 }
  0xce   : > { %v1109_v11 = vmul.f32 %v1618_v63, %v1108_v4  ;;  %v767_v24 = vsel %vm766_vm15, %v2011_v16, %v763_v13  ;;  %v437_v26 = vadd.f32 %v436_v60, %v1872_v21  ;;  %1627 = vrsqrt.f32 %v2045_v18  ;;  %vm1115_vm3 = vmor %vm1113_vm12, %vm1114_vm0 }
  0xcf   : > { %v1119_v17 = vmul.f32 %v1620_v2, %v1118_v6  ;;  %v2055_v12 = vadd.f32 %v1009_v19, %v1008_v8  ;;  %v2057_v32 = vadd.f32 1.0, %v1622_v10  ;;  %v2062_v37 = vsel %vm2034_vm11, %v771_v14, %v767_v24 }
  0xd0   : > { %v1110_v23 = vmul.f32 0.5, %v1109_v11  ;;  %1629 = vpow2.f32 %v1533_v15  ;;  %vm1124_vm1 = vweird.f32 %v1620_v2  ;;  %vm1293_vm2 = vweird.f32 %v2025_v54 }
  0xd1   : > { %v1624_v27 = vpop.eup %1623  ;;  %v1120_v29 = vmul.f32 0.5, %v1119_v17  ;;  %1631 = vrsqrt.f32 %v2055_v12  ;;  %v951_v43 = vmul.f32 %v2062_v37, %v2062_v37  ;;  %vm1303_vm4 = vweird.f32 %v2028_v58  ;;  %vm1125_vm5 = vmor %vm1123_vm14, %vm1124_vm1 }
  0xd2   : > { %v1626_v34 = vpop.eup %1625  ;;  %v1111_v35 = vsub.f32 1.5, %v1110_v23  ;;  %v1288_v3 = vmul.f32 %v1624_v27, %v2025_v54  ;;  %1633 = vrcp.f32 %v2057_v32  ;;  %v1534_v51 = vmul.f32 -1.442695, %v405_v22 }
  0xd3   : > { %v1121_v16 = vsub.f32 1.5, %v1120_v29  ;;  %v1298_v38 = vmul.f32 %v1626_v34, %v2028_v58  ;;  %v1035_v50 = vrot.slane %v951_v43, 4  ;;  %v1535_v33 = vmul.f32 -1.442695, %v437_v26 }
  0xd4   : > { %v1112_v41 = vmul.f32 %v1618_v63, %v1111_v35  ;;  %v1289_v42 = vmul.f32 %v1624_v27, %v1288_v3  ;;  %v1628_v52 = vpop.eup %1627  ;;  %vm1294_vm6 = vweird.f32 %v1624_v27  ;;  %vm1173_vm7 = vweird.f32 %v2045_v18  ;;  %v468_v3 = vpop.f32.mrf.mxu1 }
  0xd5   : > { %v1122_v44 = vmul.f32 %v1620_v2, %v1121_v16  ;;  %v1299_v47 = vmul.f32 %v1626_v34, %v1298_v38  ;;  %v1168_v0 = vmul.f32 %v1628_v52, %v2045_v18  ;;  %vm1304_vm8 = vweird.f32 %v1626_v34  ;;  %vm1295_vm9 = vmor %vm1293_vm2, %vm1294_vm6  ;;  %v375_v38 = vpop.f32.mrf.mxu2 }
  0xd6   : > { %v1116_v48 = vsel %vm1115_vm3, %v1618_v63, %v1112_v41  ;;  %v1290_v49 = vmul.f32 0.5, %v1289_v42  ;;  %v1630_v59 = vpop.eup %1629  ;;  %v1036_v1 = vadd.f32 %v1035_v50, %v951_v43  ;;  %v783_v31 = vand.u32 2147483647, %v2057_v32  ;;  %vm1305_vm10 = vmor %vm1303_vm4, %vm1304_vm8  ;;  %v407_v43 = vpop.f32.mrf.mxu3 }
  0xd7   : > { %v1347_v53 = vmul.f32 %v1116_v48, %v1959_v40  ;;  %v1126_v55 = vsel %vm1125_vm5, %v1620_v2, %v1122_v44  ;;  %v1300_v56 = vmul.f32 0.5, %v1299_v47  ;;  %v1632_v36 = vpop.eup %1631  ;;  %v1169_v4 = vmul.f32 %v1628_v52, %v1168_v0 }
  0xd8   : > { %v1348_v61 = vmul.f32 %v1126_v55, %v1966_v45  ;;  %v1291_v62 = vsub.f32 1.5, %v1290_v49  ;;  %v1178_v57 = vmul.f32 %v1632_v36, %v2055_v12  ;;  %v1634_v6 = vpop.eup %1633  ;;  %v1037_v7 = vrot.slane %v1036_v1, 2 }
  0xd9   : > { %v1301_v63 = vsub.f32 1.5, %v1300_v56  ;;  %v785_v8 = vand.u32 2147483648, %v2057_v32  ;;  %v2085_v60 = vadd.f32 1.0, %v1630_v59  ;;  %v1170_v11 = vmul.f32 0.5, %v1169_v4 }
  0xda   : > { %v1371_v40 = vpack.c.bf16 %v1348_v61, %v1347_v53  ;;  %v1292_v2 = vmul.f32 %v1624_v27, %v1291_v62  ;;  %v1179_v13 = vmul.f32 %v1632_v36, %v1178_v57  ;;  %v775_v14 = vmul.f32 %v1634_v6, %v2057_v32 }
  0xdb   : > { %v1302_v45 = vmul.f32 %v1626_v34, %v1301_v63  ;;  %vm1174_vm11 = vweird.f32 %v1628_v52  ;;  %v1038_v17 = vadd.f32 %v1037_v7, %v1036_v1  ;;  %v1171_v22 = vsub.f32 1.5, %v1170_v11 }
  0xdc   : > { %1383 = vst [vmem:[%s1900_s19] sm:$0xff] %v1371_v40  ;;  %v1296_v10 = vsel %vm1295_vm9, %v1624_v27, %v1292_v2  ;;  %v1180_v23 = vmul.f32 0.5, %v1179_v13  ;;  %v776_v24 = vsub.f32 1.0, %v775_v14  ;;  %vm1184_vm12 = vweird.f32 %v1632_v36  ;;  %vm1175_vm14 = vmor %vm1173_vm7, %vm1174_vm11  ;;  %v471_v4 = vpop.f32.mrf.mxu1 }
  0xdd   : > { %v1365_v15 = vmul.f32 %v1296_v10, %v1988_v5  ;;  %v1306_v54 = vsel %vm1305_vm10, %v1626_v34, %v1302_v45  ;;  %v1039_v26 = vrot.slane %v1038_v17, 1  ;;  %vm780_vm13 = vweird.f32 %v1634_v6 }
  0xde   : > { %v1366_v19 = vmul.f32 %v1306_v54, %v1994_v9  ;;  %1635 = vrcp.f32 %v2085_v60  ;;  %v1172_v27 = vmul.f32 %v1628_v52, %v1171_v22  ;;  %v1181_v29 = vsub.f32 1.5, %v1180_v23 }
  0xdf   : > { %v777_v35 = vmul.f32 %v1634_v6, %v776_v24  ;;  %vm1183_vm15 = vweird.f32 %v2055_v12  ;;  %v2099_v5 = vadd.f32 %v1039_v26, %v1038_v17  ;;  %vm779_vm0 = vweird.f32 %v2057_v32 }
  0xe0   : > { %v1380_v58 = vpack.c.bf16 %v1366_v19, %v1365_v15  ;;  %1637 = vpow2.f32 %v1534_v51  ;;  %v1176_v9 = vsel %vm1175_vm14, %v1628_v52, %v1172_v27  ;;  %v1182_v34 = vmul.f32 %v1632_v36, %v1181_v29  ;;  %vm1185_vm1 = vmor %vm1183_vm15, %vm1184_vm12  ;;  %v439_v52 = vpop.f32.mrf.mxu0 }
  0xe1   : > { %v778_v16 = vadd.f32 %v1634_v6, %v777_v35  ;;  %1639 = vpow2.f32 %v1535_v33  ;;  %v1353_v41 = vmul.f32 %v1176_v9, %v2005_v25  ;;  %vm781_vm2 = vmor %vm779_vm0, %vm780_vm13  ;;  %v786_v18 = vor.u32 1.1754944e-38, %v785_v8 }
  0xe2   : > { %1392 = vst [vmem:[%s1900_s19 + $0x48] sm:$0xff] %v1380_v58  ;;  %1641 = vrsqrt.f32 %v2099_v5  ;;  %v1186_v12 = vsel %vm1185_vm1, %v1632_v36, %v1182_v34  ;;  %vm784_vm3 = vcmp.eq.f32.partialorder %v783_v31, 8.507059e+37  ;;  %v469_v32 = vadd.f32 %v468_v3, %v1872_v21 }
  0xe3   : > { %v782_v42 = vsel %vm781_vm2, %v1634_v6, %v778_v16  ;;  %v1354_v47 = vmul.f32 %v1186_v12, %v2015_v39  ;;  %v376_v49 = vadd.f32 %v375_v38, %v1878_v30  ;;  %vm614_vm4 = vweird.f32 %v2085_v60 }
  0xe4   : > { %v1636_v44 = vpop.eup %1635  ;;  %v2109_v48 = vsel %vm784_vm3, %v786_v18, %v782_v42  ;;  %v1536_v51 = vmul.f32 -1.442695, %v469_v32  ;;  %v618_v21 = vand.u32 2147483647, %v2085_v60  ;;  %v408_v39 = vadd.f32 %v407_v43, %v1878_v30 }
  0xe5   : > { %v952_v25 = vmul.f32 %v2109_v48, %v2109_v48  ;;  %v610_v50 = vmul.f32 %v1636_v44, %v2085_v60  ;;  %v1374_v55 = vpack.c.bf16 %v1354_v47, %v1353_v41  ;;  %v620_v0 = vand.u32 2147483648, %v2085_v60 }
  0xe6   : > { %v1638_v53 = vpop.eup %1637  ;;  %1643 = vpow2.f32 %v1536_v51  ;;  %v1539_v63 = vmul.f32 -1.442695, %v376_v49  ;;  %v440_v1 = vadd.f32 %v439_v52, %v1878_v30  ;;  %vm615_vm5 = vweird.f32 %v1636_v44 }
  0xe7   : > { %v1640_v56 = vpop.eup %1639  ;;  %v1041_v33 = vrot.slane %v952_v25, 4  ;;  %v611_v59 = vsub.f32 1.0, %v610_v50  ;;  %v2118_v61 = vadd.f32 1.0, %v1638_v53  ;;  %1386 = vst [vmem:[%s1900_s19 + $0x18] sm:$0xff] %v1374_v55  ;;  %vm1233_vm6 = vweird.f32 %v2099_v5  ;;  %vm616_vm8 = vmor %vm614_vm4, %vm615_vm5 }
  0xe8   : > { %v2120_v62 = vpop.eup %1641  ;;  %v2124_v36 = vadd.f32 1.0, %v1640_v56  ;;  %vm2130_vm7 = vcmp.eq.f32.partialorder %v618_v21, 8.507059e+37  ;;  %v1540_v6 = vmul.f32 -1.442695, %v408_v39  ;;  %v621_v10 = vor.u32 1.1754944e-38, %v620_v0 }
  0xe9   : > { %v1228_v31 = vmul.f32 %v2120_v62, %v2099_v5  ;;  %v1042_v40 = vadd.f32 %v1041_v33, %v952_v25  ;;  %v612_v2 = vmul.f32 %v1636_v44, %v611_v59  ;;  %1645 = vrcp.f32 %v2118_v61 }
  0xea   : > { %1647 = vrcp.f32 %v2124_v36  ;;  %v1541_v11 = vmul.f32 -1.442695, %v440_v1  ;;  %v2140_v13 = vadd.f32 %v471_v4, %v1878_v30  ;;  %v633_v19 = vand.u32 2147483647, %v2118_v61 }
  0xeb   : > { %v1229_v45 = vmul.f32 %v2120_v62, %v1228_v31  ;;  %v1043_v7 = vrot.slane %v1042_v40, 2  ;;  %v613_v8 = vadd.f32 %v1636_v44, %v612_v2  ;;  %1649 = vpow2.f32 %v1539_v63 }
  0xec   : > { %v1644_v14 = vpop.eup %1643  ;;  %v635_v23 = vand.u32 2147483648, %v2118_v61  ;;  %1651 = vpow2.f32 %v1540_v6  ;;  %vm1234_vm9 = vweird.f32 %v2120_v62  ;;  %vm629_vm10 = vweird.f32 %v2118_v61 }
  0xed   : > { %v1230_v15 = vmul.f32 0.5, %v1229_v45  ;;  %v1044_v54 = vadd.f32 %v1043_v7, %v1042_v40  ;;  %v617_v17 = vsel %vm616_vm8, %v1636_v44, %v613_v8  ;;  %v2148_v60 = vadd.f32 1.0, %v1644_v14  ;;  %vm2163_vm11 = vmor %vm1233_vm6, %vm1234_vm9  ;;  %v378_v8 = vpop.f32.mrf.mxu2 }
  0xee   : > { %v2145_v22 = vsel %vm2130_vm7, %v621_v10, %v617_v17  ;;  %v648_v27 = vand.u32 2147483647, %v2124_v36  ;;  %v650_v29 = vand.u32 2147483648, %v2124_v36  ;;  %vm2167_vm12 = vcmp.eq.f32.partialorder %v633_v19, 8.507059e+37 }
  0xef   : > { %v1231_v24 = vsub.f32 1.5, %v1230_v15  ;;  %v1045_v30 = vrot.slane %v1044_v54, 1  ;;  %v941_v26 = vmul.f32 %v2145_v22, %v2145_v22  ;;  %v1646_v58 = vpop.eup %1645  ;;  %1653 = vrcp.f32 %v2148_v60 }
  0xf0   : > { %v1648_v35 = vpop.eup %1647  ;;  %v625_v16 = vmul.f32 %v1646_v58, %v2118_v61  ;;  %v636_v12 = vor.u32 1.1754944e-38, %v635_v23  ;;  %vm644_vm13 = vweird.f32 %v2124_v36  ;;  %v663_v32 = vand.u32 2147483647, %v2148_v60 }
  0xf1   : > { %v1232_v3 = vmul.f32 %v2120_v62, %v1231_v24  ;;  %v2158_v9 = vadd.f32 %v1045_v30, %v1044_v54  ;;  %v975_v34 = vrot.slane %v941_v26, 4  ;;  %v1650_v38 = vpop.eup %1649  ;;  %v640_v42 = vmul.f32 %v1648_v35, %v2124_v36 }
  0xf2   : > { %v665_v44 = vand.u32 2147483648, %v2148_v60  ;;  %v1652_v47 = vpop.eup %1651  ;;  %v626_v49 = vsub.f32 1.0, %v625_v16  ;;  %vm2179_vm14 = vcmp.eq.f32.partialorder %v648_v27, 8.507059e+37  ;;  %v651_v51 = vor.u32 1.1754944e-38, %v650_v29 }
  0xf3   : > { %v1236_v43 = vsel %vm2163_vm11, %v2120_v62, %v1232_v3  ;;  %1655 = vrsqrt.f32 %v2158_v9  ;;  %v976_v5 = vadd.f32 %v975_v34, %v941_v26  ;;  %v641_v25 = vsub.f32 1.0, %v640_v42 }
  0xf4   : > { %vm630_vm15 = vweird.f32 %v1646_v58  ;;  %vm659_vm0 = vweird.f32 %v2148_v60  ;;  %v2184_v53 = vadd.f32 1.0, %v1650_v38  ;;  %v2186_v55 = vadd.f32 1.0, %v1652_v47 }
  0xf5   : > { %v977_v52 = vrot.slane %v976_v5, 2  ;;  %v1654_v21 = vpop.eup %1653  ;;  %v2189_v39 = vmul.f32 %v1236_v43, %v2062_v37  ;;  %v627_v56 = vmul.f32 %v1646_v58, %v626_v49  ;;  %v642_v33 = vmul.f32 %v1648_v35, %v641_v25  ;;  %vm2200_vm3 = vmor %vm629_vm10, %vm630_vm15 }
  0xf6   : > { %vm645_vm1 = vweird.f32 %v1648_v35  ;;  %v655_v62 = vmul.f32 %v1654_v21, %v2148_v60  ;;  %vm2192_vm2 = vcmp.eq.f32.partialorder %v663_v32, 8.507059e+37  ;;  %v666_v63 = vor.u32 1.1754944e-38, %v665_v44 }
  0xf7   : > { %v978_v59 = vadd.f32 %v977_v52, %v976_v5  ;;  %1657 = vrcp.f32 %v2184_v53  ;;  %v628_v1 = vadd.f32 %v1646_v58, %v627_v56  ;;  %v643_v31 = vadd.f32 %v1648_v35, %v642_v33  ;;  %vm646_vm5 = vmor %vm644_vm13, %vm645_vm1 }
  0xf8   : > { %vm660_vm4 = vweird.f32 %v1654_v21  ;;  %1659 = vpow2.f32 %v1541_v11  ;;  %v656_v4 = vsub.f32 1.0, %v655_v62  ;;  %v708_v57 = vand.u32 2147483647, %v2184_v53 }
  0xf9   : > { %v1656_v40 = vpop.eup %1655  ;;  %v979_v2 = vrot.slane %v978_v59, 1  ;;  %1661 = vrcp.f32 %v2186_v55  ;;  %vm1243_vm6 = vweird.f32 %v2158_v9  ;;  %v632_v61 = vsel %vm2200_vm3, %v1646_v58, %v628_v1  ;;  %vm661_vm8 = vmor %vm659_vm0, %vm660_vm4 }
  0xfa   : > { %v1238_v6 = vmul.f32 %v1656_v40, %v2158_v9  ;;  %v647_v45 = vsel %vm646_vm5, %v1648_v35, %v643_v31  ;;  %v710_v7 = vand.u32 2147483648, %v2184_v53  ;;  %v2217_v36 = vsel %vm2167_vm12, %v636_v12, %v632_v61 }
  0xfb   : > { %v2213_v10 = vadd.f32 %v979_v2, %v978_v59  ;;  %v2221_v11 = vsel %vm2179_vm14, %v651_v51, %v647_v45  ;;  %v657_v14 = vmul.f32 %v1654_v21, %v656_v4  ;;  %v942_v54 = vmul.f32 %v2217_v36, %v2217_v36 }
  0xfc   : > { %v1239_v15 = vmul.f32 %v1656_v40, %v1238_v6  ;;  %v943_v17 = vmul.f32 %v2221_v11, %v2221_v11  ;;  %v2228_v19 = vmul.f32 -1.442695, %v2140_v13  ;;  %vm704_vm7 = vweird.f32 %v2184_v53 }
  0xfd   : > { %v1658_v23 = vpop.eup %1657  ;;  %1663 = vrsqrt.f32 %v2213_v10  ;;  %v658_v24 = vadd.f32 %v1654_v21, %v657_v14  ;;  %v2233_v30 = vadd.f32 %v378_v8, %v1870_v20  ;;  %v981_v27 = vrot.slane %v942_v54, 4 }
  0xfe   : > { %v1660_v26 = vpop.eup %1659  ;;  %v1240_v58 = vmul.f32 0.5, %v1239_v15  ;;  %v987_v29 = vrot.slane %v943_v17, 4  ;;  %v700_v13 = vmul.f32 %v1658_v23, %v2184_v53  ;;  %vm1244_vm9 = vweird.f32 %v1656_v40 }
  0xff   : > { %v1662_v35 = vpop.eup %1661  ;;  %v662_v3 = vsel %vm661_vm8, %v1654_v21, %v658_v24  ;;  %vm2239_vm10 = vcmp.eq.f32.partialorder %v708_v57, 8.507059e+37  ;;  %v711_v16 = vor.u32 1.1754944e-38, %v710_v7  ;;  %v982_v41 = vadd.f32 %v981_v27, %v942_v54  ;;  %vm1245_vm13 = vmor %vm1243_vm6, %vm1244_vm9 }
 0x100   : > { %v1241_v38 = vsub.f32 1.5, %v1240_v58  ;;  %v988_v18 = vadd.f32 %v987_v29, %v943_v17  ;;  %v2245_v12 = vsel %vm2192_vm2, %v666_v63, %v662_v3  ;;  %v701_v42 = vsub.f32 1.0, %v700_v13 }
 0x101   : > { %v944_v60 = vmul.f32 %v2245_v12, %v2245_v12  ;;  %vm705_vm11 = vweird.f32 %v1658_v23  ;;  %v715_v32 = vmul.f32 %v1662_v35, %v2186_v55  ;;  %v983_v5 = vrot.slane %v982_v41, 2 }
 0x102   : > { %v1242_v43 = vmul.f32 %v1656_v40, %v1241_v38  ;;  %v989_v44 = vrot.slane %v988_v18, 2  ;;  %vm719_vm12 = vweird.f32 %v2186_v55  ;;  %v702_v25 = vmul.f32 %v1658_v23, %v701_v42  ;;  %vm706_vm15 = vmor %vm704_vm7, %vm705_vm11 }
 0x103   : > { %v2251_v47 = vpop.eup %1663  ;;  %v993_v49 = vrot.slane %v944_v60, 4  ;;  %v716_v50 = vsub.f32 1.0, %v715_v32  ;;  %v723_v51 = vand.u32 2147483647, %v2186_v55  ;;  %v984_v56 = vadd.f32 %v983_v5, %v982_v41 }
 0x104   : > { %v1246_v52 = vsel %vm1245_vm13, %v1656_v40, %v1242_v43  ;;  %v1128_v21 = vmul.f32 %v2251_v47, %v2213_v10  ;;  %vm720_vm14 = vweird.f32 %v1662_v35  ;;  %v990_v59 = vadd.f32 %v989_v44, %v988_v18 }
 0x105   : > { %v1360_v33 = vmul.f32 %v1246_v52, %v2109_v48  ;;  %v994_v62 = vadd.f32 %v993_v49, %v944_v60  ;;  %v703_v0 = vadd.f32 %v1658_v23, %v702_v25  ;;  %v985_v63 = vrot.slane %v984_v56, 1  ;;  %vm721_vm0 = vmor %vm719_vm12, %vm720_vm14 }
 0x106   : > { %v1129_v9 = vmul.f32 %v2251_v47, %v1128_v21  ;;  %v717_v1 = vmul.f32 %v1662_v35, %v716_v50  ;;  %v725_v37 = vand.u32 2147483648, %v2186_v55  ;;  %v991_v40 = vrot.slane %v990_v59, 1 }
 0x107   : > { %v1377_v31 = vpack.c.bf16 %v1360_v33, %v2189_v39  ;;  %v995_v2 = vrot.slane %v994_v62, 2  ;;  %v707_v4 = vsel %vm706_vm15, %v1658_v23, %v703_v0  ;;  %v2266_v57 = vadd.f32 %v985_v63, %v984_v56  ;;  %v410_v0 = vpop.f32.mrf.mxu3 }
 0x108   : > { %v1130_v48 = vmul.f32 0.5, %v1129_v9  ;;  %v2270_v6 = vsel %vm2239_vm10, %v711_v16, %v707_v4  ;;  %v718_v61 = vadd.f32 %v1662_v35, %v717_v1  ;;  %v2273_v45 = vadd.f32 %v991_v40, %v990_v59  ;;  %v442_v9 = vpop.f32.mrf.mxu0 }
 0x109   : > { %1389 = vst [vmem:[%s1900_s19 + $0x30] sm:$0xff] %v1377_v31  ;;  %v996_v53 = vadd.f32 %v995_v2, %v994_v62  ;;  %v947_v7 = vmul.f32 %v2270_v6, %v2270_v6  ;;  %v2280_v39 = vadd.f32 1.0, %v1660_v26  ;;  %1665 = vrsqrt.f32 %v2266_v57 }
 0x10a   : > { %v1131_v8 = vsub.f32 1.5, %v1130_v48  ;;  %v722_v14 = vsel %vm721_vm0, %v1662_v35, %v718_v61  ;;  %v726_v15 = vor.u32 1.1754944e-38, %v725_v37  ;;  %1667 = vrsqrt.f32 %v2273_v45 }
 0x10b   : > { %v997_v54 = vrot.slane %v996_v53, 1  ;;  %v1011_v17 = vrot.slane %v947_v7, 4  ;;  %vm724_vm1 = vcmp.eq.f32.partialorder %v723_v51, 8.507059e+37  ;;  %vm1134_vm2 = vweird.f32 %v2251_v47 }
 0x10c   : > { %v1132_v23 = vmul.f32 %v2251_v47, %v1131_v8  ;;  %v2286_v24 = vsel %vm724_vm1, %v726_v15, %v722_v14  ;;  %1669 = vrcp.f32 %v2280_v39  ;;  %vm1133_vm3 = vweird.f32 %v2213_v10 }
 0x10d   : > { %v2289_v55 = vadd.f32 %v997_v54, %v996_v53  ;;  %v1012_v26 = vadd.f32 %v1011_v17, %v947_v7  ;;  %v948_v58 = vmul.f32 %v2286_v24, %v2286_v24  ;;  %1671 = vpow2.f32 %v2228_v19  ;;  %vm2296_vm4 = vmor %vm1133_vm3, %vm1134_vm2 }
 0x10e   : > { %v1545_v27 = vmul.f32 -1.442695, %v2233_v30  ;;  %v1136_v3 = vsel %vm2296_vm4, %v2251_v47, %v1132_v23  ;;  %v738_v16 = vand.u32 2147483647, %v2280_v39  ;;  %v740_v10 = vand.u32 2147483648, %v2280_v39 }
 0x10f   : > { %1673 = vrsqrt.f32 %v2289_v55  ;;  %v1013_v13 = vrot.slane %v1012_v26, 2  ;;  %v1666_v35 = vpop.eup %1665  ;;  %v1017_v34 = vrot.slane %v948_v58, 4  ;;  %vm1143_vm5 = vweird.f32 %v2266_v57 }
 0x110   : > { %v2306_v19 = vpop.eup %1667  ;;  %v1138_v30 = vmul.f32 %v1666_v35, %v2266_v57  ;;  %vm1153_vm6 = vweird.f32 %v2273_v45  ;;  %vm734_vm7 = vweird.f32 %v2280_v39  ;;  %1675 = vpow2.f32 %v1545_v27 }
 0x111   : > { %v1014_v38 = vadd.f32 %v1013_v13, %v1012_v26  ;;  %v1148_v18 = vmul.f32 %v2306_v19, %v2273_v45  ;;  %v1018_v60 = vadd.f32 %v1017_v34, %v948_v58  ;;  %v2315_v42 = vmul.f32 %v1136_v3, %v2145_v22 }
 0x112   : > { %v1670_v41 = vpop.eup %1669  ;;  %v1139_v32 = vmul.f32 %v1666_v35, %v1138_v30  ;;  %vm1144_vm8 = vweird.f32 %v1666_v35  ;;  %vm2319_vm9 = vcmp.eq.f32.partialorder %v738_v16, 8.507059e+37  ;;  %v741_v50 = vor.u32 1.1754944e-38, %v740_v10  ;;  %v474_v30 = vpop.f32.mrf.mxu1 }
 0x113   : > { %v1015_v43 = vrot.slane %v1014_v38, 1  ;;  %v730_v5 = vmul.f32 %v1670_v41, %v2280_v39  ;;  %v1672_v44 = vpop.eup %1671  ;;  %v1149_v47 = vmul.f32 %v2306_v19, %v1148_v18  ;;  %v1019_v49 = vrot.slane %v1018_v60, 2  ;;  %vm1145_vm12 = vmor %vm1143_vm5, %vm1144_vm8 }
 0x114   : > { %v1140_v52 = vmul.f32 0.5, %v1139_v32  ;;  %v2325_v56 = vadd.f32 1.0, %v1672_v44  ;;  %vm1154_vm10 = vweird.f32 %v2306_v19  ;;  %vm735_vm11 = vweird.f32 %v1670_v41 }
 0x115   : > { %v1674_v51 = vpop.eup %1673  ;;  %v2323_v21 = vadd.f32 %v1015_v43, %v1014_v38  ;;  %v731_v22 = vsub.f32 1.0, %v730_v5  ;;  %v1150_v33 = vmul.f32 0.5, %v1149_v47  ;;  %v1020_v62 = vadd.f32 %v1019_v49, %v1018_v60  ;;  %vm736_vm14 = vmor %vm734_vm7, %vm735_vm11  ;;  %v381_v47 = vpop.f32.mrf.mxu2 }
 0x116   : > { %v1158_v59 = vmul.f32 %v1674_v51, %v2289_v55  ;;  %v1141_v63 = vsub.f32 1.5, %v1140_v52  ;;  %v1676_v37 = vpop.eup %1675  ;;  %v411_v61 = vadd.f32 %v410_v0, %v1870_v20  ;;  %v443_v53 = vadd.f32 %v442_v9, %v1870_v20  ;;  %vm2346_vm15 = vmor %vm1153_vm6, %vm1154_vm10 }
 0x117   : > { %1677 = vrsqrt.f32 %v2323_v21  ;;  %v732_v1 = vmul.f32 %v1670_v41, %v731_v22  ;;  %v1151_v31 = vsub.f32 1.5, %v1150_v33  ;;  %v1021_v2 = vrot.slane %v1020_v62, 1 }
 0x118   : > { %v1159_v40 = vmul.f32 %v1674_v51, %v1158_v59  ;;  %1679 = vrcp.f32 %v2325_v56  ;;  %v1142_v4 = vmul.f32 %v1666_v35, %v1141_v63  ;;  %vm1164_vm13 = vweird.f32 %v1674_v51 }
 0x119   : > { %v733_v48 = vadd.f32 %v1670_v41, %v732_v1  ;;  %v1152_v7 = vmul.f32 %v2306_v19, %v1151_v31  ;;  %v2337_v14 = vadd.f32 %v1021_v2, %v1020_v62  ;;  %v753_v17 = vand.u32 2147483647, %v2325_v56  ;;  %v413_v2 = vpop.f32.mrf.mxu3 }
 0x11a   : > { %v1160_v8 = vmul.f32 0.5, %v1159_v40  ;;  %v1146_v15 = vsel %vm1145_vm12, %v1666_v35, %v1142_v4  ;;  %v2351_v23 = vadd.f32 1.0, %v1676_v37  ;;  %vm1163_vm0 = vweird.f32 %v2289_v55 }
 0x11b   : > { %v737_v54 = vsel %vm736_vm14, %v1670_v41, %v733_v48  ;;  %v1350_v26 = vmul.f32 %v1146_v15, %v2217_v36  ;;  %v1156_v39 = vsel %vm2346_vm15, %v2306_v19, %v1152_v7  ;;  %1681 = vrsqrt.f32 %v2337_v14  ;;  %vm1165_vm1 = vmor %vm1163_vm0, %vm1164_vm13 }
 0x11c   : > { %v1161_v58 = vsub.f32 1.5, %v1160_v8  ;;  %v2363_v45 = vsel %vm2319_vm9, %v741_v50, %v737_v54  ;;  %v755_v29 = vand.u32 2147483648, %v2325_v56  ;;  %v1546_v13 = vmul.f32 -1.442695, %v411_v61 }
 0x11d   : > { %v2358_v27 = vpop.eup %1677  ;;  %v1372_v35 = vpack.c.bf16 %v1350_v26, %v2315_v42  ;;  %v1547_v16 = vmul.f32 -1.442695, %v443_v53  ;;  %v1351_v10 = vmul.f32 %v1156_v39, %v2221_v11  ;;  %vm1193_vm2 = vweird.f32 %v2323_v21 }
 0x11e   : > { %v2366_v36 = vpop.eup %1679  ;;  %v1162_v3 = vmul.f32 %v1674_v51, %v1161_v58  ;;  %v1188_v34 = vmul.f32 %v2358_v27, %v2323_v21  ;;  %v949_v55 = vmul.f32 %v2363_v45, %v2363_v45  ;;  %1683 = vrcp.f32 %v2351_v23 }
 0x11f   : > { %v745_v19 = vmul.f32 %v2366_v36, %v2325_v56  ;;  %1384 = vst [vmem:[%s1900_s19 + $0x8] sm:$0xff] %v1372_v35  ;;  %vm749_vm3 = vweird.f32 %v2325_v56  ;;  %vm2382_vm4 = vcmp.eq.f32.partialorder %v753_v17, 8.507059e+37  ;;  %v756_v32 = vor.u32 1.1754944e-38, %v755_v29 }
 0x120   : > { %v1166_v38 = vsel %vm1165_vm1, %v1674_v51, %v1162_v3  ;;  %v1189_v41 = vmul.f32 %v2358_v27, %v1188_v34  ;;  %v1023_v60 = vrot.slane %v949_v55, 4  ;;  %vm1194_vm5 = vweird.f32 %v2358_v27 }
 0x121   : > { %v1352_v18 = vmul.f32 %v1166_v38, %v2245_v12  ;;  %v746_v42 = vsub.f32 1.0, %v745_v19  ;;  %v1682_v43 = vpop.eup %1681  ;;  %1685 = vpow2.f32 %v1546_v13  ;;  %v475_v44 = vadd.f32 %v474_v30, %v1870_v20  ;;  %vm2409_vm11 = vmor %vm1193_vm2, %vm1194_vm5 }
 0x122   : > { %v1190_v5 = vmul.f32 0.5, %v1189_v41  ;;  %v1198_v25 = vmul.f32 %v1682_v43, %v2337_v14  ;;  %vm1203_vm6 = vweird.f32 %v2337_v14  ;;  %v1024_v50 = vadd.f32 %v1023_v60, %v949_v55 }
 0x123   : > { %v1373_v49 = vpack.c.bf16 %v1352_v18, %v1351_v10  ;;  %vm750_vm7 = vweird.f32 %v2366_v36  ;;  %v747_v51 = vmul.f32 %v2366_v36, %v746_v42  ;;  %vm794_vm8 = vweird.f32 %v2351_v23 }
 0x124   : > { %v1191_v12 = vsub.f32 1.5, %v1190_v5  ;;  %v798_v52 = vand.u32 2147483647, %v2351_v23  ;;  %1687 = vpow2.f32 %v1547_v16  ;;  %v1684_v22 = vpop.eup %1683  ;;  %v1199_v20 = vmul.f32 %v1682_v43, %v1198_v25  ;;  %vm751_vm10 = vmor %vm749_vm3, %vm750_vm7 }
 0x125   : > { %1385 = vst [vmem:[%s1900_s19 + $0x10] sm:$0xff] %v1373_v49  ;;  %v1025_v33 = vrot.slane %v1024_v50, 2  ;;  %v1548_v59 = vmul.f32 -1.442695, %v475_v44  ;;  %v382_v62 = vadd.f32 %v381_v47, %v1876_v28  ;;  %v748_v9 = vadd.f32 %v2366_v36, %v747_v51 }
 0x126   : > { %v1192_v0 = vmul.f32 %v2358_v27, %v1191_v12  ;;  %v790_v63 = vmul.f32 %v1684_v22, %v2351_v23  ;;  %v800_v1 = vand.u32 2147483648, %v2351_v23  ;;  %v1200_v37 = vmul.f32 0.5, %v1199_v20 }
 0x127   : > { %vm1204_vm9 = vweird.f32 %v1682_v43  ;;  %v1026_v31 = vadd.f32 %v1025_v33, %v1024_v50  ;;  %v1551_v40 = vmul.f32 -1.442695, %v382_v62  ;;  %v1686_v4 = vpop.eup %1685  ;;  %v752_v61 = vsel %vm751_vm10, %v2366_v36, %v748_v9 }
 0x128   : > { %v791_v53 = vsub.f32 1.0, %v790_v63  ;;  %vm795_vm12 = vweird.f32 %v1684_v22  ;;  %1689 = vpow2.f32 %v1548_v59  ;;  %v1196_v56 = vsel %vm2409_vm11, %v2358_v27, %v1192_v0  ;;  %vm1205_vm13 = vmor %vm1203_vm6, %vm1204_vm9 }
 0x129   : > { %v1201_v7 = vsub.f32 1.5, %v1200_v37  ;;  %v1027_v8 = vrot.slane %v1026_v31, 1  ;;  %v2419_v15 = vsel %vm2382_vm4, %v756_v32, %v752_v61  ;;  %v2423_v17 = vadd.f32 1.0, %v1686_v4  ;;  %vm796_vm14 = vmor %vm794_vm8, %vm795_vm12 }
 0x12a   : > { %v1688_v21 = vpop.eup %1687  ;;  %v950_v57 = vmul.f32 %v2419_v15, %v2419_v15  ;;  %v792_v54 = vmul.f32 %v1684_v22, %v791_v53  ;;  %v414_v26 = vadd.f32 %v413_v2, %v1876_v28  ;;  %1691 = vpow2.f32 %v1551_v40 }
 0x12b   : > { %v1202_v39 = vmul.f32 %v1682_v43, %v1201_v7  ;;  %v2426_v58 = vadd.f32 %v1027_v8, %v1026_v31  ;;  %v2428_v29 = vadd.f32 1.0, %v1688_v21  ;;  %v1355_v27 = vmul.f32 %v1196_v56, %v2270_v6 }
 0x12c   : > { %v1029_v13 = vrot.slane %v950_v57, 4  ;;  %v793_v36 = vadd.f32 %v1684_v22, %v792_v54  ;;  %1693 = vrcp.f32 %v2423_v17  ;;  %v801_v3 = vor.u32 1.1754944e-38, %v800_v1 }
 0x12d   : > { %v1206_v35 = vsel %vm1205_vm13, %v1682_v43, %v1202_v39  ;;  %1695 = vrsqrt.f32 %v2426_v58  ;;  %vm799_vm15 = vcmp.eq.f32.partialorder %v798_v52, 8.507059e+37  ;;  %v813_v55 = vand.u32 2147483647, %v2423_v17 }
 0x12e   : > { %v1690_v34 = vpop.eup %1689  ;;  %v1356_v6 = vmul.f32 %v1206_v35, %v2286_v24  ;;  %v1030_v16 = vadd.f32 %v1029_v13, %v950_v57  ;;  %v797_v10 = vsel %vm796_vm14, %v1684_v22, %v793_v36  ;;  %1697 = vrcp.f32 %v2428_v29  ;;  %v445_v22 = vpop.f32.mrf.mxu0 }
 0x12f   : > { %v2440_v14 = vsel %vm799_vm15, %v801_v3, %v797_v10  ;;  %v1552_v38 = vmul.f32 -1.442695, %v414_v26  ;;  %v2446_v11 = vadd.f32 1.0, %v1690_v34  ;;  %vm809_vm0 = vweird.f32 %v2423_v17 }
 0x130   : > { %v1375_v19 = vpack.c.bf16 %v1356_v6, %v1355_v27  ;;  %v1031_v30 = vrot.slane %v1030_v16, 2  ;;  %v953_v23 = vmul.f32 %v2440_v14, %v2440_v14  ;;  %v1692_v41 = vpop.eup %1691  ;;  %vm2453_vm1 = vcmp.eq.f32.partialorder %v813_v55, 8.507059e+37 }
 0x131   : > { %v815_v5 = vand.u32 2147483648, %v2423_v17  ;;  %v828_v44 = vand.u32 2147483647, %v2428_v29  ;;  %1699 = vpow2.f32 %v1552_v38  ;;  %v830_v51 = vand.u32 2147483648, %v2428_v29 }
 0x132   : > { %v1694_v18 = vpop.eup %1693  ;;  %1387 = vst [vmem:[%s1900_s19 + $0x20] sm:$0xff] %v1375_v19  ;;  %v1032_v24 = vadd.f32 %v1031_v30, %v1030_v16  ;;  %v1047_v60 = vrot.slane %v953_v23, 4  ;;  %1701 = vrcp.f32 %v2446_v11  ;;  %v2463_v52 = vadd.f32 1.0, %v1692_v41 }
 0x133   : > { %v2450_v42 = vpop.eup %1695  ;;  %v805_v32 = vmul.f32 %v1694_v18, %v2423_v17  ;;  %vm810_vm2 = vweird.f32 %v1694_v18  ;;  %v816_v9 = vor.u32 1.1754944e-38, %v815_v5  ;;  %vm824_vm3 = vweird.f32 %v2428_v29 }
 0x134   : > { %v1208_v47 = vmul.f32 %v2450_v42, %v2426_v58  ;;  %v1033_v49 = vrot.slane %v1032_v24, 1  ;;  %v1048_v25 = vadd.f32 %v1047_v60, %v953_v23  ;;  %v1698_v50 = vpop.eup %1697  ;;  %v2472_v37 = vadd.f32 %v445_v22, %v1876_v28  ;;  %vm811_vm5 = vmor %vm809_vm0, %vm810_vm2 }
 0x135   : > { %v806_v12 = vsub.f32 1.0, %v805_v32  ;;  %v820_v62 = vmul.f32 %v1698_v50, %v2428_v29  ;;  %vm1213_vm4 = vweird.f32 %v2426_v58  ;;  %v843_v2 = vand.u32 2147483647, %v2446_v11 }
 0x136   : > { %v1209_v20 = vmul.f32 %v2450_v42, %v1208_v47  ;;  %v2466_v33 = vadd.f32 %v1033_v49, %v1032_v24  ;;  %v1049_v59 = vrot.slane %v1048_v25, 2  ;;  %vm2479_vm6 = vcmp.eq.f32.partialorder %v828_v44, 8.507059e+37 }
 0x137   : > { %v807_v0 = vmul.f32 %v1694_v18, %v806_v12  ;;  %v821_v40 = vsub.f32 1.0, %v820_v62  ;;  %v1700_v4 = vpop.eup %1699  ;;  %v831_v53 = vor.u32 1.1754944e-38, %v830_v51  ;;  %v845_v56 = vand.u32 2147483648, %v2446_v11 }
 0x138   : > { %v1210_v63 = vmul.f32 0.5, %v1209_v20  ;;  %1703 = vrsqrt.f32 %v2466_v33  ;;  %v1050_v1 = vadd.f32 %v1049_v59, %v1048_v25  ;;  %v1702_v7 = vpop.eup %1701  ;;  %vm1214_vm7 = vweird.f32 %v2450_v42 }
 0x139   : > { %v808_v31 = vadd.f32 %v1694_v18, %v807_v0  ;;  %1705 = vrcp.f32 %v2463_v52  ;;  %v822_v57 = vmul.f32 %v1698_v50, %v821_v40  ;;  %vm825_vm8 = vweird.f32 %v1698_v50  ;;  %vm2519_vm15 = vmor %vm1213_vm4, %vm1214_vm7 }
 0x13a   : > { %v1051_v48 = vrot.slane %v1050_v1, 1  ;;  %v1211_v8 = vsub.f32 1.5, %v1210_v63  ;;  %v835_v17 = vmul.f32 %v1702_v7, %v2446_v11  ;;  %vm839_vm9 = vweird.f32 %v2446_v11  ;;  %vm826_vm12 = vmor %vm824_vm3, %vm825_vm8 }
 0x13b   : > { %v812_v21 = vsel %vm811_vm5, %v1694_v18, %v808_v31  ;;  %v823_v27 = vadd.f32 %v1698_v50, %v822_v57  ;;  %vm2495_vm10 = vcmp.eq.f32.partialorder %v843_v2, 8.507059e+37  ;;  %v846_v3 = vor.u32 1.1754944e-38, %v845_v56 }
 0x13c   : > { %v2485_v54 = vadd.f32 %v1051_v48, %v1050_v1  ;;  %v2489_v26 = vsel %vm2453_vm1, %v816_v9, %v812_v21  ;;  %v836_v35 = vsub.f32 1.0, %v835_v17  ;;  %v2500_v34 = vadd.f32 1.0, %v1700_v4  ;;  %v477_v17 = vpop.f32.mrf.mxu1 }
 0x13d   : > { %v954_v39 = vmul.f32 %v2489_v26, %v2489_v26  ;;  %v1212_v16 = vmul.f32 %v2450_v42, %v1211_v8  ;;  %vm1223_vm11 = vweird.f32 %v2466_v33  ;;  %vm884_vm13 = vweird.f32 %v2463_v52 }
 0x13e   : > { %v1704_v36 = vpop.eup %1703  ;;  %1707 = vrsqrt.f32 %v2485_v54  ;;  %v827_v19 = vsel %vm826_vm12, %v1698_v50, %v823_v27  ;;  %v837_v30 = vmul.f32 %v1702_v7, %v836_v35  ;;  %vm840_vm14 = vweird.f32 %v1702_v7 }
 0x13f   : > { %v1706_v6 = vpop.eup %1705  ;;  %v1218_v10 = vmul.f32 %v1704_v36, %v2466_v33  ;;  %v1053_v55 = vrot.slane %v954_v39, 4  ;;  %v2512_v18 = vsel %vm2479_vm6, %v831_v53, %v827_v19  ;;  %v888_v24 = vand.u32 2147483647, %v2463_v52  ;;  %vm841_vm0 = vmor %vm839_vm9, %vm840_vm14 }
 0x140   : > { %v880_v23 = vmul.f32 %v1706_v6, %v2463_v52  ;;  %v955_v60 = vmul.f32 %v2512_v18, %v2512_v18  ;;  %v838_v32 = vadd.f32 %v1702_v7, %v837_v30  ;;  %1709 = vrcp.f32 %v2500_v34 }
 0x141   : > { %v1219_v38 = vmul.f32 %v1704_v36, %v1218_v10  ;;  %v1054_v41 = vadd.f32 %v1053_v55, %v954_v39  ;;  %v1216_v5 = vsel %vm2519_vm15, %v2450_v42, %v1212_v16  ;;  %v890_v58 = vand.u32 2147483648, %v2463_v52 }
 0x142   : > { %v881_v43 = vsub.f32 1.0, %v880_v23  ;;  %v1059_v25 = vrot.slane %v955_v60, 4  ;;  %v842_v50 = vsel %vm841_vm0, %v1702_v7, %v838_v32  ;;  %vm885_vm1 = vweird.f32 %v1706_v6 }
 0x143   : > { %v1220_v44 = vmul.f32 0.5, %v1219_v38  ;;  %v1055_v47 = vrot.slane %v1054_v41, 2  ;;  %vm1224_vm2 = vweird.f32 %v1704_v36  ;;  %v2538_v59 = vsel %vm2495_vm10, %v846_v3, %v842_v50  ;;  %vm886_vm4 = vmor %vm884_vm13, %vm885_vm1 }
 0x144   : > { %v2532_v49 = vpop.eup %1707  ;;  %v882_v12 = vmul.f32 %v1706_v6, %v881_v43  ;;  %v1060_v42 = vadd.f32 %v1059_v25, %v955_v60  ;;  %vm2540_vm3 = vcmp.eq.f32.partialorder %v888_v24, 8.507059e+37  ;;  %v956_v1 = vmul.f32 %v2538_v59, %v2538_v59  ;;  %vm1225_vm5 = vmor %vm1223_vm11, %vm1224_vm2 }
 0x145   : > { %v1221_v51 = vsub.f32 1.5, %v1220_v44  ;;  %v1248_v22 = vmul.f32 %v2532_v49, %v2485_v54  ;;  %v1056_v20 = vadd.f32 %v1055_v47, %v1054_v41  ;;  %v1357_v40 = vmul.f32 %v1216_v5, %v2363_v45 }
 0x146   : > { %v883_v11 = vadd.f32 %v1706_v6, %v882_v12  ;;  %v1710_v31 = vpop.eup %1709  ;;  %v1061_v2 = vrot.slane %v1060_v42, 2  ;;  %v891_v48 = vor.u32 1.1754944e-38, %v890_v58  ;;  %v1065_v56 = vrot.slane %v956_v1, 4 }
 0x147   : > { %v1222_v0 = vmul.f32 %v1704_v36, %v1221_v51  ;;  %v1249_v9 = vmul.f32 %v2532_v49, %v1248_v22  ;;  %v1057_v63 = vrot.slane %v1056_v20, 1  ;;  %v1553_v7 = vmul.f32 -1.442695, %v2472_v37 }
 0x148   : > { %v887_v4 = vsel %vm886_vm4, %v1706_v6, %v883_v11  ;;  %v1062_v52 = vadd.f32 %v1061_v2, %v1060_v42  ;;  %v895_v45 = vmul.f32 %v1710_v31, %v2500_v34  ;;  %v1066_v57 = vadd.f32 %v1065_v56, %v956_v1 }
 0x149   : > { %v1226_v61 = vsel %vm1225_vm5, %v1704_v36, %v1222_v0  ;;  %v2552_v53 = vadd.f32 %v1057_v63, %v1056_v20  ;;  %v2558_v21 = vsel %vm2540_vm3, %v891_v48, %v887_v4  ;;  %v1250_v33 = vmul.f32 0.5, %v1249_v9 }
 0x14a   : > { %v1358_v8 = vmul.f32 %v1226_v61, %v2419_v15  ;;  %v1063_v27 = vrot.slane %v1062_v52, 1  ;;  %v959_v37 = vmul.f32 %v2558_v21, %v2558_v21  ;;  %v896_v13 = vsub.f32 1.0, %v895_v45 }
 0x14b   : > { %1711 = vrsqrt.f32 %v2552_v53  ;;  %v1067_v15 = vrot.slane %v1066_v57, 2  ;;  %v903_v36 = vand.u32 2147483647, %v2500_v34  ;;  %v905_v35 = vand.u32 2147483648, %v2500_v34 }
 0x14c   : > { %v1376_v39 = vpack.c.bf16 %v1358_v8, %v1357_v40  ;;  %1713 = vpow2.f32 %v1553_v7  ;;  %v2567_v3 = vadd.f32 %v1063_v27, %v1062_v52  ;;  %v1083_v6 = vrot.slane %v959_v37, 4 }
 0x14d   : > { %v897_v16 = vmul.f32 %v1710_v31, %v896_v13  ;;  %v478_v10 = vadd.f32 %v477_v17, %v1876_v28  ;;  %v1251_v55 = vsub.f32 1.5, %v1250_v33  ;;  %v1068_v19 = vadd.f32 %v1067_v15, %v1066_v57 }
 0x14e   : > { %1388 = vst [vmem:[%s1900_s19 + $0x28] sm:$0xff] %v1376_v39  ;;  %vm900_vm6 = vweird.f32 %v1710_v31  ;;  %1715 = vrsqrt.f32 %v2567_v3  ;;  %v1084_v30 = vadd.f32 %v1083_v6, %v959_v37  ;;  %vm899_vm7 = vweird.f32 %v2500_v34 }
 0x14f   : > { %vm1254_vm8 = vweird.f32 %v2532_v49  ;;  %v1069_v38 = vrot.slane %v1068_v19, 1  ;;  %v898_v41 = vadd.f32 %v1710_v31, %v897_v16  ;;  %v1554_v24 = vmul.f32 -1.442695, %v478_v10  ;;  %vm901_vm9 = vmor %vm899_vm7, %vm900_vm6 }
 0x150   : > { %v1085_v60 = vrot.slane %v1084_v30, 2  ;;  %vm904_vm10 = vcmp.eq.f32.partialorder %v903_v36, 8.507059e+37  ;;  %v906_v28 = vor.u32 1.1754944e-38, %v905_v35  ;;  %v1252_v43 = vmul.f32 %v2532_v49, %v1251_v55 }
 0x151   : > { %v1712_v23 = vpop.eup %1711  ;;  %v2575_v5 = vadd.f32 %v1069_v38, %v1068_v19  ;;  %v902_v44 = vsel %vm901_vm9, %v1710_v31, %v898_v41  ;;  %1717 = vpow2.f32 %v1554_v24  ;;  %vm1253_vm11 = vweird.f32 %v2485_v54 }
 0x152   : > { %v1258_v29 = vmul.f32 %v1712_v23, %v2552_v53  ;;  %v1714_v32 = vpop.eup %1713  ;;  %v1086_v47 = vadd.f32 %v1085_v60, %v1084_v30  ;;  %v2577_v58 = vsel %vm904_vm10, %v906_v28, %v902_v44  ;;  %vm1255_vm12 = vmor %vm1253_vm11, %vm1254_vm8  ;;  %vm1264_vm13 = vweird.f32 %v1712_v23 }
 0x153   : > { %v2579_v25 = vadd.f32 1.0, %v1714_v32  ;;  %1719 = vrsqrt.f32 %v2575_v5  ;;  %v960_v50 = vmul.f32 %v2577_v58, %v2577_v58  ;;  %v1256_v11 = vsel %vm1255_vm12, %v2532_v49, %v1252_v43 }
 0x154   : > { %v1259_v34 = vmul.f32 %v1712_v23, %v1258_v29  ;;  %v1716_v12 = vpop.eup %1715  ;;  %v1087_v22 = vrot.slane %v1086_v47, 1  ;;  %vm1263_vm14 = vweird.f32 %v2552_v53  ;;  %v1361_v40 = vmul.f32 %v1256_v11, %v2440_v14 }
 0x155   : > { %1721 = vrcp.f32 %v2579_v25  ;;  %v1268_v20 = vmul.f32 %v1716_v12, %v2567_v3  ;;  %v1089_v42 = vrot.slane %v960_v50, 4  ;;  %vm1265_vm15 = vmor %vm1263_vm14, %vm1264_vm13  ;;  %vm1274_vm0 = vweird.f32 %v1716_v12 }
 0x156   : > { %v1260_v51 = vmul.f32 0.5, %v1259_v34  ;;  %v2590_v0 = vadd.f32 %v1087_v22, %v1086_v47  ;;  %vm1273_vm1 = vweird.f32 %v2567_v3  ;;  %v918_v37 = vand.u32 2147483647, %v2579_v25 }
 0x157   : > { %v1718_v9 = vpop.eup %1717  ;;  %v1269_v63 = vmul.f32 %v1716_v12, %v1268_v20  ;;  %v1090_v1 = vadd.f32 %v1089_v42, %v960_v50  ;;  %vm2606_vm2 = vmor %vm1273_vm1, %vm1274_vm0  ;;  %v920_v36 = vand.u32 2147483648, %v2579_v25  ;;  %vm1283_vm5 = vweird.f32 %v2575_v5 }
 0x158   : > { %v1261_v62 = vsub.f32 1.5, %v1260_v51  ;;  %1723 = vrsqrt.f32 %v2590_v0  ;;  %v2595_v48 = vadd.f32 1.0, %v1718_v9  ;;  %vm914_vm7 = vweird.f32 %v2579_v25 }
 0x159   : > { %v1720_v31 = vpop.eup %1719  ;;  %v1270_v2 = vmul.f32 0.5, %v1269_v63  ;;  %v1091_v4 = vrot.slane %v1090_v1, 2  ;;  %v921_v38 = vor.u32 1.1754944e-38, %v920_v36  ;;  %vm919_vm9 = vcmp.eq.f32.partialorder %v918_v37, 8.507059e+37 }
 0x15a   : > { %v1262_v54 = vmul.f32 %v1712_v23, %v1261_v62  ;;  %v1278_v56 = vmul.f32 %v1720_v31, %v2575_v5  ;;  %1725 = vrcp.f32 %v2595_v48  ;;  %vm1284_vm3 = vweird.f32 %v1720_v31 }
 0x15b   : > { %v1722_v49 = vpop.eup %1721  ;;  %v1271_v8 = vsub.f32 1.5, %v1270_v2  ;;  %v1092_v52 = vadd.f32 %v1091_v4, %v1090_v1  ;;  %vm1285_vm6 = vmor %vm1283_vm5, %vm1284_vm3  ;;  %vm929_vm12 = vweird.f32 %v2595_v48 }
 0x15c   : > { %v1266_v61 = vsel %vm1265_vm15, %v1712_v23, %v1262_v54  ;;  %v910_v53 = vmul.f32 %v1722_v49, %v2579_v25  ;;  %v1279_v45 = vmul.f32 %v1720_v31, %v1278_v56  ;;  %vm915_vm4 = vweird.f32 %v1722_v49 }
 0x15d   : > { %v1362_v7 = vmul.f32 %v1266_v61, %v2489_v26  ;;  %v1272_v33 = vmul.f32 %v1716_v12, %v1271_v8  ;;  %v1093_v57 = vrot.slane %v1092_v52, 1  ;;  %vm916_vm8 = vmor %vm914_vm7, %vm915_vm4  ;;  %v933_v25 = vand.u32 2147483647, %v2595_v48  ;;  %v448_v8 = vpop.f32.mrf.mxu0 }
 0x15e   : > { %v911_v17 = vsub.f32 1.0, %v910_v53  ;;  %v2601_v39 = vpop.eup %1723  ;;  %v1280_v27 = vmul.f32 0.5, %v1279_v45  ;;  %vm1313_vm15 = vweird.f32 %v2590_v0 }
 0x15f   : > { %v1378_v14 = vpack.c.bf16 %v1362_v7, %v1361_v40  ;;  %v1308_v13 = vmul.f32 %v2601_v39, %v2590_v0  ;;  %v2612_v15 = vadd.f32 %v1093_v57, %v1092_v52  ;;  %v1276_v35 = vsel %vm2606_vm2, %v1716_v12, %v1272_v33  ;;  %v416_v0 = vpop.f32.mrf.mxu3  ;;  %v480_v52 = vpop.f32.mrf.mxu1 }
 0x160   : > { %v1281_v3 = vsub.f32 1.5, %v1280_v27  ;;  %v912_v6 = vmul.f32 %v1722_v49, %v911_v17  ;;  %v1726_v10 = vpop.eup %1725  ;;  %v1363_v30 = vmul.f32 %v1276_v35, %v2512_v18  ;;  %v935_v18 = vand.u32 2147483648, %v2595_v48 }
 0x161   : > { %1390 = vst [vmem:[%s1900_s19 + $0x38] sm:$0xff] %v1378_v14  ;;  %v1309_v16 = vmul.f32 %v2601_v39, %v1308_v13  ;;  %1727 = vrsqrt.f32 %v2612_v15  ;;  %v925_v41 = vmul.f32 %v1726_v10, %v2595_v48  ;;  %vm930_vm10 = vweird.f32 %v1726_v10  ;;  %v384_v48 = vpop.f32.mrf.mxu2 }
 0x162   : > { %v1282_v55 = vmul.f32 %v1720_v31, %v1281_v3  ;;  %v913_v19 = vadd.f32 %v1722_v49, %v912_v6  ;;  %vm1314_vm11 = vweird.f32 %v2601_v39  ;;  %vm931_vm13 = vmor %vm929_vm12, %vm930_vm10  ;;  %v936_v42 = vor.u32 1.1754944e-38, %v935_v18 }
 0x163   : > { %v1310_v23 = vmul.f32 0.5, %v1309_v16  ;;  %v926_v32 = vsub.f32 1.0, %v925_v41  ;;  %vm934_vm14 = vcmp.eq.f32.partialorder %v933_v25, 8.507059e+37  ;;  %vm2636_vm0 = vmor %vm1313_vm15, %vm1314_vm11  ;;  %vm1323_vm2 = vweird.f32 %v2612_v15 }
 0x164   : > { %v1286_v24 = vsel %vm1285_vm6, %v1720_v31, %v1282_v55  ;;  %v917_v29 = vsel %vm916_vm8, %v1722_v49, %v913_v19  ;;  %v385_v56 = vadd.f32 %v384_v48, %v1888_v46  ;;  %v417_v7 = vadd.f32 %v416_v0, %v1888_v46 }
 0x165   : > { %v1364_v60 = vmul.f32 %v1286_v24, %v2538_v59  ;;  %v2624_v28 = vsel %vm919_vm9, %v921_v38, %v917_v29  ;;  %v1311_v43 = vsub.f32 1.5, %v1310_v23  ;;  %v927_v47 = vmul.f32 %v1726_v10, %v926_v32 }
 0x166   : > { %v961_v5 = vmul.f32 %v2624_v28, %v2624_v28  ;;  %v449_v14 = vadd.f32 %v448_v8, %v1888_v46  ;;  %v481_v33 = vadd.f32 %v480_v52, %v1888_v46 }
 0x167   : > { %v1728_v44 = vpop.eup %1727  ;;  %v1379_v34 = vpack.c.bf16 %v1364_v60, %v1363_v30  ;;  %v928_v59 = vadd.f32 %v1726_v10, %v927_v47  ;;  %v1312_v51 = vmul.f32 %v2601_v39, %v1311_v43 }
 0x168   : > { %v1318_v50 = vmul.f32 %v1728_v44, %v2612_v15  ;;  %v1095_v12 = vrot.slane %v961_v5, 4  ;;  %vm1324_vm1 = vweird.f32 %v1728_v44  ;;  %v1397_v26 = vpack.c.bf16 %v481_v33, %v449_v14 }
 0x169   : > { %1391 = vst [vmem:[%s1900_s19 + $0x40] sm:$0xff] %v1379_v34  ;;  %v932_v11 = vsel %vm931_vm13, %v1726_v10, %v928_v59  ;;  %v1316_v31 = vsel %vm2636_vm0, %v2601_v39, %v1312_v51  ;;  %vm1325_vm3 = vmor %vm1323_vm2, %vm1324_vm1  ;;  %v1396_v39 = vpack.c.bf16 %v417_v7, %v385_v56 }
 0x16a   : > { %v1319_v22 = vmul.f32 %v1728_v44, %v1318_v50  ;;  %v1096_v20 = vadd.f32 %v1095_v12, %v961_v5  ;;  %v937_v63 = vsel %vm934_vm14, %v936_v42, %v932_v11  ;;  %v1367_v53 = vmul.f32 %v1316_v31, %v2558_v21  ;;  %1400 = vst [vmem:[%s1900_s19 + $0x70] sm:$0x11] %v1397_v26 }
 0x16b   : > { %v962_v54 = vmul.f32 %v937_v63, %v937_v63  ;;  %1399 = vst [vmem:[%s1900_s19 + $0x68] sm:$0x11] %v1396_v39 }
 0x16c   : > { %v1320_v62 = vmul.f32 0.5, %v1319_v22  ;;  %v1097_v9 = vrot.slane %v1096_v20, 2 }
 0x16d   : > { %v1101_v4 = vrot.slane %v962_v54, 4 }
 0x16e   : > { %v1321_v40 = vsub.f32 1.5, %v1320_v62  ;;  %v1098_v2 = vadd.f32 %v1097_v9, %v1096_v20 }
 0x16f   : > { %v1102_v45 = vadd.f32 %v1101_v4, %v962_v54 }
 0x170   : > { %v1322_v49 = vmul.f32 %v1728_v44, %v1321_v40  ;;  %v1099_v61 = vrot.slane %v1098_v2, 1 }
 0x171   : > { %v1103_v37 = vrot.slane %v1102_v45, 2 }
 0x172   : > { %v1326_v57 = vsel %vm1325_vm3, %v1728_v44, %v1322_v49  ;;  %v1100_v17 = vadd.f32 %v1099_v61, %v1098_v2 }
 0x173   : > { %v1368_v27 = vmul.f32 %v1326_v57, %v2577_v58  ;;  %v1104_v15 = vadd.f32 %v1103_v37, %v1102_v45 }
 0x174   : > { %1729 = vrsqrt.f32 %v1100_v17  ;;  %vm1333_vm5 = vweird.f32 %v1100_v17 }
 0x175   : > { %v1381_v13 = vpack.c.bf16 %v1368_v27, %v1367_v53  ;;  %v1105_v21 = vrot.slane %v1104_v15, 1 }
 0x177   : > { %1393 = vst [vmem:[%s1900_s19 + $0x50] sm:$0xff] %v1381_v13  ;;  %v1106_v36 = vadd.f32 %v1105_v21, %v1104_v15 }
 0x179   : > { %1731 = vrsqrt.f32 %v1106_v36  ;;  %vm1343_vm8 = vweird.f32 %v1106_v36 }
 0x17a   : > { %v1730_v35 = vpop.eup %1729 }
 0x17b   : > { %v1328_v3 = vmul.f32 %v1730_v35, %v1100_v17  ;;  %vm1334_vm4 = vweird.f32 %v1730_v35 }
 0x17c   : > { %vm1335_vm6 = vmor %vm1333_vm5, %vm1334_vm4 }
 0x17d   : > { %v1329_v6 = vmul.f32 %v1730_v35, %v1328_v3 }
 0x17f   : > { %v1330_v46 = vmul.f32 0.5, %v1329_v6  ;;  %v1732_v16 = vpop.eup %1731 }
 0x180   : > { %v1338_v55 = vmul.f32 %v1732_v16, %v1106_v36  ;;  %vm1344_vm7 = vweird.f32 %v1732_v16 }
 0x181   : > { %v1331_v10 = vsub.f32 1.5, %v1330_v46  ;;  %vm1345_vm9 = vmor %vm1343_vm8, %vm1344_vm7 }
 0x182   : > { %v1339_v58 = vmul.f32 %v1732_v16, %v1338_v55 }
 0x183   : > { %v1332_v19 = vmul.f32 %v1730_v35, %v1331_v10 }
 0x184   : > { %v1340_v30 = vmul.f32 0.5, %v1339_v58 }
 0x185   : > { %v1336_v23 = vsel %vm1335_vm6, %v1730_v35, %v1332_v19 }
 0x186   : > { %v1341_v38 = vsub.f32 1.5, %v1340_v30  ;;  %v1369_v24 = vmul.f32 %v1336_v23, %v2624_v28 }
 0x188   : > { %v1342_v41 = vmul.f32 %v1732_v16, %v1341_v38 }
 0x18a   : > { %v1346_v29 = vsel %vm1345_vm9, %v1732_v16, %v1342_v41 }
 0x18b   : > { %v1370_v60 = vmul.f32 %v1346_v29, %v937_v63 }
 0x18d   : > { %v1382_v32 = vpack.c.bf16 %v1370_v60, %v1369_v24 }
 0x18f   : > { %1394 = vst [vmem:[%s1900_s19 + $0x58] sm:$0xff] %v1382_v32 }
 0x190 PF: > { %s13_s14 = sadd.s32 1, %s1755_s14   ;;  %s2718_s12 = smov %s1751_s13 }
 0x191   : > { %p10_p5 = scmp.ge.s32.totalorder %s13_s14, 4   ;;  %s2719_s13 = smov %s2721_s15 }
 0x193   :  { %12 = sbr.rel (!%p10_p5) target bundleno = 2 (0x2), region = 64 }

</bundles_post_ra>
